<compile_context>
chip_gen: v7x
topology: tpu7x:2x2x1
jax: 0.10.0
libtpu: 0.0.40
codegen_flags: <defaults>
</compile_context>

<pallas_src>
import jax
import jax.numpy as jnp
from jax import lax
from jax.experimental import pallas as pl
from jax.experimental.pallas import tpu as pltpu

NEG_INF = -1e30
F32 = jnp.float32
BF16 = jnp.bfloat16

FEAT = 128      # padded feature lanes (64/48/32/2 all live in one 128-lane slab)
IN_PAD = 8      # raw input features padded 3 -> 8 (sublane alignment)

# indices into the packed (9, 128, 128) weight stack
W_GAT, W_A1, W_AG, W_A2, W_A3, W_C1A, W_C1B, W_C2, W_C3 = range(9)


def _mm_t(a, w):
    # a @ w.T  with w stored PyTorch-style as (out_features, in_features)
    return lax.dot_general(a, w, (((1,), (1,)), ((), ())), preferred_element_type=F32)


# ----------------------------------------------------------------------------
# Fused kernel: [GCNConv(3->64) -> GATConv(64->64, heads=1, edge_dim=1) ->
#                GraphAggregator(64,48,32) -> scatter_mean]  per side (grid axis),
#               then MLP([64,32,32,2]) on concat(embed_s, embed_t) on the last step.
# ----------------------------------------------------------------------------
def gcngat_kernel(
    x_ref, ahat_ref, ea_ref, onehot_ref,
    w_gcn_ref, w_ref, bias_ref,
    out_ref, emb_s_ref,
):
    side = pl.program_id(0)

    x = x_ref[...]            # (N, 8)   raw features (3 real cols, zero-padded)
    ahat = ahat_ref[...]      # (N, N)   bf16, A + I, indexed [dst, src]
    ea = ea_ref[...]          # (N, N)   dense edge_attr (self-loop slots = mean attr)
    onehot = onehot_ref[...]  # (B, N)   graph membership
    bias = bias_ref[...]      # (16, 128) packed parameter slab

    b_gcn, b_gat = bias[0:1, :], bias[1:2, :]
    att_src, att_dst = bias[2:3, :], bias[3:4, :]
    b_a1, b_ag, b_a2, b_a3 = bias[4:5, :], bias[5:6, :], bias[6:7, :], bias[7:8, :]
    b_c1, b_c2, b_c3 = bias[8:9, :], bias[9:10, :], bias[10:11, :]
    prelu_a = bias[11:12, 0:1]    # (1, 1) PReLU weight
    c_edge = bias[11:12, 1:2]     # (1, 1) att_edge . W_edge (hoisted to wrapper)

    # ---------------- GCNConv(3 -> 64), symmetric norm, self loops in ahat ----------------
    deg = jnp.sum(ahat.astype(F32), axis=1, keepdims=True)     # (N, 1) in-degree + 1
    dinv = lax.rsqrt(deg)
    h = _mm_t(x, w_gcn_ref[...])                               # (N, 128) = x @ W^T (no bias)
    h = (dinv * h).astype(BF16)                                # src-side norm, bf16 for MXU
    agg = jnp.dot(ahat, h, preferred_element_type=F32)         # aggregate over src (bf16 MXU)
    x1 = dinv * agg + b_gcn                                    # dst-side norm + bias

    # ---------------- GATConv(64 -> 64, heads=1, edge_dim=1) ----------------
    z = _mm_t(x1, w_ref[W_GAT])                                # (N, 128)  lin (no bias)
    a_dst = jnp.sum(z * att_dst, axis=1, keepdims=True)        # (N, 1) per dst, VPU reduce
    a_src = lax.dot_general(att_src, z, (((1,), (1,)), ((), ())),
                            preferred_element_type=F32)        # (1, N) per src
    raw = a_dst + a_src + ea * c_edge                          # (N, N) [dst, src]
    logits = jnp.where(ahat > 0,
                       jnp.where(raw >= 0, raw, 0.2 * raw),    # leaky_relu(0.2) + mask fused
                       NEG_INF)
    m = jnp.max(logits, axis=1, keepdims=True)
    p = jnp.exp(logits - m)                                    # masked entries exp -> 0 exactly
    att = p / jnp.sum(p, axis=1, keepdims=True)                # segment softmax per dst
    x2 = jnp.dot(att.astype(BF16), z.astype(BF16),
                 preferred_element_type=F32) + b_gat           # (N, 128)

    # ---------------- GraphAggregator (64 -> 32, hidden 48), one 128-lane slab ----------------
    s_val = _mm_t(x2, w_ref[W_A1]) + b_a1
    s_val = jnp.where(s_val >= 0, s_val, prelu_a * s_val)      # PReLU
    g = _mm_t(x2, w_ref[W_AG]) + b_ag                          # pad lanes carry -1e30 bias
    g = g - jnp.max(g, axis=1, keepdims=True)                  # softmax over feature dim (dim=1)
    g = jnp.exp(g)
    g = g / jnp.sum(g, axis=1, keepdims=True)
    hh = s_val * g
    hh = _mm_t(hh, w_ref[W_A2]) + b_a2                         # (N, 128), real [:, :48]
    hh = jnp.where(hh >= 0, hh, 0.01 * hh)                     # LeakyReLU (default slope)
    hh = _mm_t(hh, w_ref[W_A3]) + b_a3                         # (N, 128), real [:, :32]

    # ---------------- scatter_mean over x_batch (dim=0) ----------------
    sums = jnp.dot(onehot, hh, preferred_element_type=F32)     # (B, 128)
    counts = jnp.sum(onehot, axis=1, keepdims=True)            # (B, 1)
    pooled = sums / jnp.maximum(counts, 1.0)                   # (B, 128), real [:, :32]

    @pl.when(side == 0)
    def _():
        emb_s_ref[...] = pooled                                # persists across grid steps

    # ---------------- classification MLP([64, 32, 32, 2]) on the last step ----------------
    # All activations stay 128-lane padded (zeros in pad lanes) -> unmasked vector stores.
    # TODO(synk): PyG MLP default norm='batch_norm' is treated as eval mode with default
    #             running stats (mean=0, var=1), i.e. a constant 1/sqrt(1+eps) scale.
    @pl.when(side == pl.num_programs(0) - 1)
    def _():
        bn = (1.0 + 1e-5) ** -0.5
        e_s = emb_s_ref[...]                                   # side-s embedding (B, 128)
        e_t = pooled                                           # side-t embedding (this step)
        h1 = _mm_t(e_s, w_ref[W_C1A]) + _mm_t(e_t, w_ref[W_C1B]) + b_c1
        h1 = jnp.maximum(h1 * bn, 0.0)                         # == concat(e_s,e_t) @ W1^T + b1
        h2 = _mm_t(h1, w_ref[W_C2]) + b_c2
        h2 = jnp.maximum(h2 * bn, 0.0)
        out_ref[...] = _mm_t(h2, w_ref[W_C3]) + b_c3           # (B, 128), real [:, :2]


# ----------------------------------------------------------------------------
# Parameter packing / padding (done once in the wrapper)
# ----------------------------------------------------------------------------
def _pad_mat(w, rows, cols):
    w = jnp.asarray(w, F32)
    return jnp.zeros((rows, cols), F32).at[: w.shape[0], : w.shape[1]].set(w)


def _pad_row(v, fill=0.0):
    v = jnp.asarray(v, F32).reshape(-1)
    return jnp.full((FEAT,), fill, F32).at[: v.shape[0]].set(v)


def prepare_params(p):
    # GAT edge contribution: alpha_edge = edge_attr * (att_edge . W_edge)  -> single scalar
    c_edge = jnp.sum(p["att_edge"].reshape(-1) * p["w_edge"].reshape(-1))
    rows = [
        _pad_row(p["b_gcn"]),                    # 0
        _pad_row(p["b_gat"]),                    # 1
        _pad_row(p["att_src"]),                  # 2
        _pad_row(p["att_dst"]),                  # 3
        _pad_row(p["agg_b1"]),                   # 4
        _pad_row(p["agg_bg"], fill=NEG_INF),     # 5  pad lanes -> -inf so feature softmax exact
        _pad_row(p["agg_b2"]),                   # 6
        _pad_row(p["agg_b3"]),                   # 7
        _pad_row(p["cls_b1"]),                   # 8
        _pad_row(p["cls_b2"]),                   # 9
        _pad_row(p["cls_b3"]),                   # 10
        jnp.zeros((FEAT,), F32).at[0].set(p["prelu_a"].reshape(())).at[1].set(c_edge),  # 11
    ]
    slab = jnp.zeros((16, FEAT), F32).at[: len(rows)].set(jnp.stack(rows))

    # nine square weights packed into one grid-invariant (9, 128, 128) stack
    wbig = jnp.stack([
        _pad_mat(p["w_gat"], FEAT, FEAT),            # W_GAT
        _pad_mat(p["agg_w1"], FEAT, FEAT),           # W_A1
        _pad_mat(p["agg_wg"], FEAT, FEAT),           # W_AG
        _pad_mat(p["agg_w2"], FEAT, FEAT),           # W_A2
        _pad_mat(p["agg_w3"], FEAT, FEAT),           # W_A3
        _pad_mat(p["cls_w1"][:, :32], FEAT, FEAT),   # W_C1A (embed_s half)
        _pad_mat(p["cls_w1"][:, 32:], FEAT, FEAT),   # W_C1B (embed_t half)
        _pad_mat(p["cls_w2"], FEAT, FEAT),           # W_C2
        _pad_mat(p["cls_w3"], FEAT, FEAT),           # W_C3
    ])
    w_gcn = _pad_mat(p["w_gcn"], FEAT, IN_PAD)
    return w_gcn, wbig, slab


# ----------------------------------------------------------------------------
# Graph structure glue: edge list -> dense structures (one side)
# ----------------------------------------------------------------------------
def build_dense_side(x, edge_index, edge_attr, batch, num_graphs, n_pad):
    n = x.shape[0]
    x_p = jnp.zeros((n_pad, IN_PAD), F32).at[:n, : x.shape[1]].set(x)
    src, dst = edge_index[0], edge_index[1]
    # TODO(synk): duplicate edges collapse to 1.0 here; PyG delivers one message per duplicate.
    adj = jnp.zeros((n_pad, n_pad), F32).at[dst, src].set(1.0)
    ahat = adj + jnp.eye(n_pad, dtype=F32)                        # add self loops (also pad nodes)
    mean_attr = jnp.mean(edge_attr[:, 0])                         # fill_value='mean' for self loops
    ea = jnp.zeros((n_pad, n_pad), F32).at[dst, src].set(edge_attr[:, 0])
    ea = ea + jnp.eye(n_pad, dtype=F32) * mean_attr
    batch_p = jnp.full((n_pad,), -1, jnp.int32).at[:n].set(batch)  # pad nodes join no graph
    onehot = (batch_p[None, :] == jnp.arange(num_graphs)[:, None]).astype(F32)
    return x_p, ahat.astype(BF16), ea, onehot


# ----------------------------------------------------------------------------
# Forward wrapper: one fused pallas_call
# ----------------------------------------------------------------------------
def gcngat_forward(params, data, num_graphs):
    w_gcn, wbig, slab = prepare_params(params)

    n_pad = max(data["x_s"].shape[0], data["x_t"].shape[0])
    n_pad = ((n_pad + 7) // 8) * 8
    sides = [
        build_dense_side(data["x_s"], data["edge_index_s"], data["edge_attr_s"],
                         data["x_s_batch"], num_graphs, n_pad),
        build_dense_side(data["x_t"], data["edge_index_t"], data["edge_attr_t"],
                         data["x_t_batch"], num_graphs, n_pad),
    ]
    x2 = jnp.stack([s[0] for s in sides])       # (2, N, 8)  f32
    ahat2 = jnp.stack([s[1] for s in sides])    # (2, N, N)  bf16
    ea2 = jnp.stack([s[2] for s in sides])      # (2, N, N)  f32
    oh2 = jnp.stack([s[3] for s in sides])      # (2, B, N)  f32

    N = n_pad
    B = num_graphs

    in_specs = [
        pl.BlockSpec((None, N, IN_PAD), lambda s: (s, 0, 0)),   # x (per side)
        pl.BlockSpec((None, N, N), lambda s: (s, 0, 0)),        # ahat (per side)
        pl.BlockSpec((None, N, N), lambda s: (s, 0, 0)),        # edge attr (per side)
        pl.BlockSpec((None, B, N), lambda s: (s, 0, 0)),        # one-hot batch (per side)
        pl.BlockSpec((FEAT, IN_PAD), lambda s: (0, 0)),         # GCN weight (grid-invariant)
        pl.BlockSpec((9, FEAT, FEAT), lambda s: (0, 0, 0)),     # packed weight stack
        pl.BlockSpec((16, FEAT), lambda s: (0, 0)),             # packed bias/param slab
    ]

    grid_spec = pltpu.PrefetchScalarGridSpec(
        num_scalar_prefetch=0,
        grid=(2,),                                              # one grid step per graph side
        in_specs=in_specs,
        out_specs=pl.BlockSpec((B, FEAT), lambda s: (0, 0)),    # resident; written on last step
        scratch_shapes=[pltpu.VMEM((B, FEAT), F32)],            # side-s embedding, persists
    )
    out = pl.pallas_call(
        gcngat_kernel,
        out_shape=jax.ShapeDtypeStruct((B, FEAT), F32),
        grid_spec=grid_spec,
        compiler_params=pltpu.CompilerParams(
            # "arbitrary": step 1 (side t + classifier) consumes the scratch written in step 0.
            dimension_semantics=("arbitrary",),
            vmem_limit_bytes=32 * 1024 * 1024,
        ),
    )(x2, ahat2, ea2, oh2, w_gcn, wbig, slab)
    return out[:, :2]                                           # real logits


# ----------------------------------------------------------------------------
# Parameter init (natural PyTorch-style shapes)
# ----------------------------------------------------------------------------
def init_params(key):
    ks = jax.random.split(key, 22)

    def rn(k, shape, scale=0.1):
        return scale * jax.random.normal(k, shape, dtype=F32)

    return dict(
        # GCNConv(3, 64)
        w_gcn=rn(ks[0], (64, 3)), b_gcn=rn(ks[1], (1, 64)),
        # GATConv(64, 64, heads=1, edge_dim=1)
        w_gat=rn(ks[2], (64, 64)), b_gat=rn(ks[3], (1, 64)),
        att_src=rn(ks[4], (1, 64)), att_dst=rn(ks[5], (1, 64)),
        w_edge=rn(ks[6], (64, 1)), att_edge=rn(ks[7], (1, 64)),
        # GraphAggregator(64, 48, 32)
        agg_w1=rn(ks[8], (32, 64)), agg_b1=rn(ks[9], (1, 32)),
        prelu_a=jnp.full((1, 1), 0.25, F32),
        agg_wg=rn(ks[10], (32, 64)), agg_bg=rn(ks[11], (1, 32)),
        agg_w2=rn(ks[12], (48, 32)), agg_b2=rn(ks[13], (1, 48)),
        agg_w3=rn(ks[14], (32, 48)), agg_b3=rn(ks[15], (1, 32)),
        # MLP([64, 32, 32, 2])
        cls_w1=rn(ks[16], (32, 64)), cls_b1=rn(ks[17], (1, 32)),
        cls_w2=rn(ks[18], (32, 32)), cls_b2=rn(ks[19], (1, 32)),
        cls_w3=rn(ks[20], (2, 32)), cls_b3=rn(ks[21], (1, 2)),
    )


if __name__ == "__main__":
    key = jax.random.PRNGKey(0)
    k_xs, k_xt, k_eas, k_eat, k_par = jax.random.split(key, 5)

    N = 8          # nodes per side (2 graphs x 4 nodes)
    B = 2          # graphs per side
    x_batch = jnp.array([0, 0, 0, 0, 1, 1, 1, 1], dtype=jnp.int32)

    # source-side graph: edges within each of the two graphs (no self loops)
    edge_index_s = jnp.array(
        [[0, 1, 1, 2, 3, 4, 5, 6, 7],
         [1, 0, 2, 3, 0, 5, 6, 7, 4]], dtype=jnp.int32)
    edge_attr_s = jax.random.normal(k_eas, (edge_index_s.shape[1], 1), dtype=F32)

    # target-side graph
    edge_index_t = jnp.array(
        [[0, 1, 2, 3, 2, 4, 5, 6, 7, 6],
         [1, 2, 3, 0, 0, 5, 6, 7, 4, 4]], dtype=jnp.int32)
    edge_attr_t = jax.random.normal(k_eat, (edge_index_t.shape[1], 1), dtype=F32)

    data = dict(
        x_s=jax.random.normal(k_xs, (N, 3), dtype=F32),
        x_t=jax.random.normal(k_xt, (N, 3), dtype=F32),
        edge_index_s=edge_index_s, edge_index_t=edge_index_t,
        edge_attr_s=edge_attr_s, edge_attr_t=edge_attr_t,
        x_s_batch=x_batch, x_t_batch=x_batch,
    )

    params = init_params(k_par)
    out = gcngat_forward(params, data, num_graphs=B)
    out = jax.block_until_ready(out)
    assert out.shape == (B, 2)
    print("KERNEL_OK")
</pallas_src>

<mosaic_0001>
module attributes {stable_mosaic.version = 11 : i64} {
  func.func @gcngat_kernel(%arg0: i32, %arg1: memref<1x8x8xf32, #tpu.memory_space<vmem>>, %arg2: memref<1x8x8xbf16, #tpu.memory_space<vmem>>, %arg3: memref<1x8x8xf32, #tpu.memory_space<vmem>>, %arg4: memref<1x2x8xf32, #tpu.memory_space<vmem>>, %arg5: memref<128x8xf32, #tpu.memory_space<vmem>>, %arg6: memref<9x128x128xf32, #tpu.memory_space<vmem>>, %arg7: memref<16x128xf32, #tpu.memory_space<vmem>>, %arg8: memref<2x128xf32, #tpu.memory_space<vmem>>, %arg9: memref<2x128xf32, #tpu.memory_space<vmem>>) attributes {dimension_semantics = [#tpu.dimension_semantics<arbitrary>], iteration_bounds = array<i64: 2>, scalar_prefetch = 0 : i64, scratch_operands = 1 : i64, tpu.core_type = #tpu.core_type<tc>, window_params = [{transform_indices = @transform_0, window_bounds = array<i64: 1, 8, 8>}, {transform_indices = @transform_1, window_bounds = array<i64: 1, 8, 8>}, {transform_indices = @transform_2, window_bounds = array<i64: 1, 8, 8>}, {transform_indices = @transform_3, window_bounds = array<i64: 1, 2, 8>}, {pipeline_mode = #tpu.pipeline_mode<synchronous>, transform_indices = @transform_4, window_bounds = array<i64: 128, 8>}, {pipeline_mode = #tpu.pipeline_mode<synchronous>, transform_indices = @transform_5, window_bounds = array<i64: 9, 128, 128>}, {pipeline_mode = #tpu.pipeline_mode<synchronous>, transform_indices = @transform_6, window_bounds = array<i64: 16, 128>}, {pipeline_mode = #tpu.pipeline_mode<synchronous>, transform_indices = @transform_7, window_bounds = array<i64: 2, 128>}]} {
    %c0 = arith.constant 0 : index
    %c0_0 = arith.constant 0 : index
    %c0_1 = arith.constant 0 : index
    %0 = vector.load %arg1[%c0, %c0_0, %c0_1] : memref<1x8x8xf32, #tpu.memory_space<vmem>>, vector<1x8x8xf32>
    %1 = vector.shape_cast %0 : vector<1x8x8xf32> to vector<8x8xf32>
    %c0_2 = arith.constant 0 : index
    %c0_3 = arith.constant 0 : index
    %c0_4 = arith.constant 0 : index
    %2 = vector.load %arg2[%c0_2, %c0_3, %c0_4] : memref<1x8x8xbf16, #tpu.memory_space<vmem>>, vector<1x8x8xbf16>
    %3 = vector.shape_cast %2 : vector<1x8x8xbf16> to vector<8x8xbf16>
    %c0_5 = arith.constant 0 : index
    %c0_6 = arith.constant 0 : index
    %c0_7 = arith.constant 0 : index
    %4 = vector.load %arg3[%c0_5, %c0_6, %c0_7] : memref<1x8x8xf32, #tpu.memory_space<vmem>>, vector<1x8x8xf32>
    %5 = vector.shape_cast %4 : vector<1x8x8xf32> to vector<8x8xf32>
    %c0_8 = arith.constant 0 : index
    %c0_9 = arith.constant 0 : index
    %c0_10 = arith.constant 0 : index
    %6 = vector.load %arg4[%c0_8, %c0_9, %c0_10] : memref<1x2x8xf32, #tpu.memory_space<vmem>>, vector<1x2x8xf32>
    %7 = vector.shape_cast %6 : vector<1x2x8xf32> to vector<2x8xf32>
    %c0_11 = arith.constant 0 : index
    %c0_12 = arith.constant 0 : index
    %8 = vector.load %arg7[%c0_11, %c0_12] : memref<16x128xf32, #tpu.memory_space<vmem>>, vector<16x128xf32>
    %9 = vector.extract_strided_slice %8 {offsets = [0, 0], sizes = [1, 128], strides = [1, 1]} : vector<16x128xf32> to vector<1x128xf32>
    %10 = vector.extract_strided_slice %8 {offsets = [1, 0], sizes = [1, 128], strides = [1, 1]} : vector<16x128xf32> to vector<1x128xf32>
    %11 = vector.extract_strided_slice %8 {offsets = [2, 0], sizes = [1, 128], strides = [1, 1]} : vector<16x128xf32> to vector<1x128xf32>
    %12 = vector.extract_strided_slice %8 {offsets = [3, 0], sizes = [1, 128], strides = [1, 1]} : vector<16x128xf32> to vector<1x128xf32>
    %13 = vector.extract_strided_slice %8 {offsets = [4, 0], sizes = [1, 128], strides = [1, 1]} : vector<16x128xf32> to vector<1x128xf32>
    %14 = vector.extract_strided_slice %8 {offsets = [5, 0], sizes = [1, 128], strides = [1, 1]} : vector<16x128xf32> to vector<1x128xf32>
    %15 = vector.extract_strided_slice %8 {offsets = [6, 0], sizes = [1, 128], strides = [1, 1]} : vector<16x128xf32> to vector<1x128xf32>
    %16 = vector.extract_strided_slice %8 {offsets = [7, 0], sizes = [1, 128], strides = [1, 1]} : vector<16x128xf32> to vector<1x128xf32>
    %17 = vector.extract_strided_slice %8 {offsets = [8, 0], sizes = [1, 128], strides = [1, 1]} : vector<16x128xf32> to vector<1x128xf32>
    %18 = vector.extract_strided_slice %8 {offsets = [9, 0], sizes = [1, 128], strides = [1, 1]} : vector<16x128xf32> to vector<1x128xf32>
    %19 = vector.extract_strided_slice %8 {offsets = [10, 0], sizes = [1, 128], strides = [1, 1]} : vector<16x128xf32> to vector<1x128xf32>
    %20 = vector.extract_strided_slice %8 {offsets = [11, 0], sizes = [1, 1], strides = [1, 1]} : vector<16x128xf32> to vector<1x1xf32>
    %21 = vector.extract_strided_slice %8 {offsets = [11, 1], sizes = [1, 1], strides = [1, 1]} : vector<16x128xf32> to vector<1x1xf32>
    %22 = arith.extf %3 : vector<8x8xbf16> to vector<8x8xf32>
    %cst = arith.constant dense<0.000000e+00> : vector<8xf32>
    %23 = vector.multi_reduction <add>, %22, %cst [1] : vector<8x8xf32> to vector<8xf32>
    %24 = vector.shape_cast %23 : vector<8xf32> to vector<8x1xf32>
    %25 = math.rsqrt %24 : vector<8x1xf32>
    %c0_13 = arith.constant 0 : index
    %c0_14 = arith.constant 0 : index
    %26 = vector.load %arg5[%c0_13, %c0_14] : memref<128x8xf32, #tpu.memory_space<vmem>>, vector<128x8xf32>
    %cst_15 = arith.constant dense<0.000000e+00> : vector<8x128xf32>
    %27 = tpu.matmul %1, %26, %cst_15 {dimension_numbers = #tpu.dot_dimension_numbers<[1], [1], [0], [0], [0, 0, 1, 0], [], []>} : vector<8x8xf32>, vector<128x8xf32>, vector<8x128xf32> -> vector<8x128xf32>
    %28 = vector.broadcast %25 : vector<8x1xf32> to vector<8x128xf32>
    %29 = arith.mulf %28, %27 : vector<8x128xf32>
    %30 = arith.truncf %29 : vector<8x128xf32> to vector<8x128xbf16>
    %cst_16 = arith.constant dense<0.000000e+00> : vector<8x128xf32>
    %31 = tpu.matmul %3, %30, %cst_16 {dimension_numbers = #tpu.dot_dimension_numbers<[1], [0], [0], [1], [0, 0, 1, 1], [], []>} : vector<8x8xbf16>, vector<8x128xbf16>, vector<8x128xf32> -> vector<8x128xf32>
    %32 = vector.broadcast %25 : vector<8x1xf32> to vector<8x128xf32>
    %33 = arith.mulf %32, %31 : vector<8x128xf32>
    %34 = vector.broadcast %9 : vector<1x128xf32> to vector<8x128xf32>
    %35 = arith.addf %33, %34 : vector<8x128xf32>
    %c0_17 = arith.constant 0 : index
    %c0_18 = arith.constant 0 : index
    %c0_19 = arith.constant 0 : index
    %36 = vector.load %arg6[%c0_17, %c0_18, %c0_19] : memref<9x128x128xf32, #tpu.memory_space<vmem>>, vector<1x128x128xf32>
    %37 = vector.shape_cast %36 : vector<1x128x128xf32> to vector<128x128xf32>
    %cst_20 = arith.constant dense<0.000000e+00> : vector<8x128xf32>
    %38 = tpu.matmul %35, %37, %cst_20 {dimension_numbers = #tpu.dot_dimension_numbers<[1], [1], [0], [0], [0, 0, 1, 0], [], []>} : vector<8x128xf32>, vector<128x128xf32>, vector<8x128xf32> -> vector<8x128xf32>
    %39 = vector.broadcast %12 : vector<1x128xf32> to vector<8x128xf32>
    %40 = arith.mulf %38, %39 : vector<8x128xf32>
    %cst_21 = arith.constant dense<0.000000e+00> : vector<8xf32>
    %41 = vector.multi_reduction <add>, %40, %cst_21 [1] : vector<8x128xf32> to vector<8xf32>
    %42 = vector.shape_cast %41 : vector<8xf32> to vector<8x1xf32>
    %cst_22 = arith.constant dense<0.000000e+00> : vector<1x8xf32>
    %43 = tpu.matmul %11, %38, %cst_22 {dimension_numbers = #tpu.dot_dimension_numbers<[1], [1], [0], [0], [0, 0, 1, 0], [], []>} : vector<1x128xf32>, vector<8x128xf32>, vector<1x8xf32> -> vector<1x8xf32>
    %44 = vector.broadcast %42 : vector<8x1xf32> to vector<8x8xf32>
    %45 = vector.broadcast %43 : vector<1x8xf32> to vector<8x8xf32>
    %46 = arith.addf %44, %45 : vector<8x8xf32>
    %47 = vector.broadcast %21 : vector<1x1xf32> to vector<8x8xf32>
    %48 = arith.mulf %5, %47 : vector<8x8xf32>
    %49 = arith.addf %46, %48 : vector<8x8xf32>
    %cst_23 = arith.constant 0.000000e+00 : bf16
    %50 = vector.broadcast %cst_23 : bf16 to vector<8x8xbf16>
    %51 = arith.cmpf ogt, %3, %50 : vector<8x8xbf16>
    %cst_24 = arith.constant 0.000000e+00 : f32
    %52 = vector.broadcast %cst_24 : f32 to vector<8x8xf32>
    %53 = arith.cmpf oge, %49, %52 : vector<8x8xf32>
    %cst_25 = arith.constant 2.000000e-01 : f32
    %54 = vector.broadcast %cst_25 : f32 to vector<8x8xf32>
    %55 = arith.mulf %54, %49 : vector<8x8xf32>
    %56 = arith.select %53, %49, %55 : vector<8x8xi1>, vector<8x8xf32>
    %cst_26 = arith.constant -1.000000e+30 : f32
    %57 = vector.broadcast %cst_26 : f32 to vector<8x8xf32>
    %58 = arith.select %51, %56, %57 : vector<8x8xi1>, vector<8x8xf32>
    %cst_27 = arith.constant dense<0xFF800000> : vector<8xf32>
    %59 = vector.multi_reduction <maximumf>, %58, %cst_27 [1] : vector<8x8xf32> to vector<8xf32>
    %60 = vector.shape_cast %59 : vector<8xf32> to vector<8x1xf32>
    %61 = vector.broadcast %60 : vector<8x1xf32> to vector<8x8xf32>
    %62 = arith.subf %58, %61 : vector<8x8xf32>
    %63 = math.exp %62 : vector<8x8xf32>
    %cst_28 = arith.constant dense<0.000000e+00> : vector<8xf32>
    %64 = vector.multi_reduction <add>, %63, %cst_28 [1] : vector<8x8xf32> to vector<8xf32>
    %65 = vector.shape_cast %64 : vector<8xf32> to vector<8x1xf32>
    %66 = vector.broadcast %65 : vector<8x1xf32> to vector<8x8xf32>
    %67 = arith.divf %63, %66 : vector<8x8xf32>
    %68 = arith.truncf %67 : vector<8x8xf32> to vector<8x8xbf16>
    %69 = arith.truncf %38 : vector<8x128xf32> to vector<8x128xbf16>
    %cst_29 = arith.constant dense<0.000000e+00> : vector<8x128xf32>
    %70 = tpu.matmul %68, %69, %cst_29 {dimension_numbers = #tpu.dot_dimension_numbers<[1], [0], [0], [1], [0, 0, 1, 1], [], []>} : vector<8x8xbf16>, vector<8x128xbf16>, vector<8x128xf32> -> vector<8x128xf32>
    %71 = vector.broadcast %10 : vector<1x128xf32> to vector<8x128xf32>
    %72 = arith.addf %70, %71 : vector<8x128xf32>
    %c1 = arith.constant 1 : index
    %c0_30 = arith.constant 0 : index
    %c0_31 = arith.constant 0 : index
    %73 = vector.load %arg6[%c1, %c0_30, %c0_31] : memref<9x128x128xf32, #tpu.memory_space<vmem>>, vector<1x128x128xf32>
    %74 = vector.shape_cast %73 : vector<1x128x128xf32> to vector<128x128xf32>
    %cst_32 = arith.constant dense<0.000000e+00> : vector<8x128xf32>
    %75 = tpu.matmul %72, %74, %cst_32 {dimension_numbers = #tpu.dot_dimension_numbers<[1], [1], [0], [0], [0, 0, 1, 0], [], []>} : vector<8x128xf32>, vector<128x128xf32>, vector<8x128xf32> -> vector<8x128xf32>
    %76 = vector.broadcast %13 : vector<1x128xf32> to vector<8x128xf32>
    %77 = arith.addf %75, %76 : vector<8x128xf32>
    %cst_33 = arith.constant 0.000000e+00 : f32
    %78 = vector.broadcast %cst_33 : f32 to vector<8x128xf32>
    %79 = arith.cmpf oge, %77, %78 : vector<8x128xf32>
    %80 = vector.broadcast %20 : vector<1x1xf32> to vector<8x128xf32>
    %81 = arith.mulf %80, %77 : vector<8x128xf32>
    %82 = arith.select %79, %77, %81 : vector<8x128xi1>, vector<8x128xf32>
    %c2 = arith.constant 2 : index
    %c0_34 = arith.constant 0 : index
    %c0_35 = arith.constant 0 : index
    %83 = vector.load %arg6[%c2, %c0_34, %c0_35] : memref<9x128x128xf32, #tpu.memory_space<vmem>>, vector<1x128x128xf32>
    %84 = vector.shape_cast %83 : vector<1x128x128xf32> to vector<128x128xf32>
    %cst_36 = arith.constant dense<0.000000e+00> : vector<8x128xf32>
    %85 = tpu.matmul %72, %84, %cst_36 {dimension_numbers = #tpu.dot_dimension_numbers<[1], [1], [0], [0], [0, 0, 1, 0], [], []>} : vector<8x128xf32>, vector<128x128xf32>, vector<8x128xf32> -> vector<8x128xf32>
    %86 = vector.broadcast %14 : vector<1x128xf32> to vector<8x128xf32>
    %87 = arith.addf %85, %86 : vector<8x128xf32>
    %cst_37 = arith.constant dense<0xFF800000> : vector<8xf32>
    %88 = vector.multi_reduction <maximumf>, %87, %cst_37 [1] : vector<8x128xf32> to vector<8xf32>
    %89 = vector.shape_cast %88 : vector<8xf32> to vector<8x1xf32>
    %90 = vector.broadcast %89 : vector<8x1xf32> to vector<8x128xf32>
    %91 = arith.subf %87, %90 : vector<8x128xf32>
    %92 = math.exp %91 : vector<8x128xf32>
    %cst_38 = arith.constant dense<0.000000e+00> : vector<8xf32>
    %93 = vector.multi_reduction <add>, %92, %cst_38 [1] : vector<8x128xf32> to vector<8xf32>
    %94 = vector.shape_cast %93 : vector<8xf32> to vector<8x1xf32>
    %95 = vector.broadcast %94 : vector<8x1xf32> to vector<8x128xf32>
    %96 = arith.divf %92, %95 : vector<8x128xf32>
    %97 = arith.mulf %82, %96 : vector<8x128xf32>
    %c3 = arith.constant 3 : index
    %c0_39 = arith.constant 0 : index
    %c0_40 = arith.constant 0 : index
    %98 = vector.load %arg6[%c3, %c0_39, %c0_40] : memref<9x128x128xf32, #tpu.memory_space<vmem>>, vector<1x128x128xf32>
    %99 = vector.shape_cast %98 : vector<1x128x128xf32> to vector<128x128xf32>
    %cst_41 = arith.constant dense<0.000000e+00> : vector<8x128xf32>
    %100 = tpu.matmul %97, %99, %cst_41 {dimension_numbers = #tpu.dot_dimension_numbers<[1], [1], [0], [0], [0, 0, 1, 0], [], []>} : vector<8x128xf32>, vector<128x128xf32>, vector<8x128xf32> -> vector<8x128xf32>
    %101 = vector.broadcast %15 : vector<1x128xf32> to vector<8x128xf32>
    %102 = arith.addf %100, %101 : vector<8x128xf32>
    %cst_42 = arith.constant 0.000000e+00 : f32
    %103 = vector.broadcast %cst_42 : f32 to vector<8x128xf32>
    %104 = arith.cmpf oge, %102, %103 : vector<8x128xf32>
    %cst_43 = arith.constant 0.00999999977 : f32
    %105 = vector.broadcast %cst_43 : f32 to vector<8x128xf32>
    %106 = arith.mulf %105, %102 : vector<8x128xf32>
    %107 = arith.select %104, %102, %106 : vector<8x128xi1>, vector<8x128xf32>
    %c4 = arith.constant 4 : index
    %c0_44 = arith.constant 0 : index
    %c0_45 = arith.constant 0 : index
    %108 = vector.load %arg6[%c4, %c0_44, %c0_45] : memref<9x128x128xf32, #tpu.memory_space<vmem>>, vector<1x128x128xf32>
    %109 = vector.shape_cast %108 : vector<1x128x128xf32> to vector<128x128xf32>
    %cst_46 = arith.constant dense<0.000000e+00> : vector<8x128xf32>
    %110 = tpu.matmul %107, %109, %cst_46 {dimension_numbers = #tpu.dot_dimension_numbers<[1], [1], [0], [0], [0, 0, 1, 0], [], []>} : vector<8x128xf32>, vector<128x128xf32>, vector<8x128xf32> -> vector<8x128xf32>
    %111 = vector.broadcast %16 : vector<1x128xf32> to vector<8x128xf32>
    %112 = arith.addf %110, %111 : vector<8x128xf32>
    %cst_47 = arith.constant dense<0.000000e+00> : vector<2x128xf32>
    %113 = tpu.matmul %7, %112, %cst_47 {dimension_numbers = #tpu.dot_dimension_numbers<[1], [0], [0], [1], [0, 0, 1, 1], [], []>} : vector<2x8xf32>, vector<8x128xf32>, vector<2x128xf32> -> vector<2x128xf32>
    %cst_48 = arith.constant dense<0.000000e+00> : vector<2xf32>
    %114 = vector.multi_reduction <add>, %7, %cst_48 [1] : vector<2x8xf32> to vector<2xf32>
    %115 = vector.shape_cast %114 : vector<2xf32> to vector<2x1xf32>
    %cst_49 = arith.constant 1.000000e+00 : f32
    %116 = vector.broadcast %cst_49 : f32 to vector<2x1xf32>
    %117 = arith.maximumf %115, %116 : vector<2x1xf32>
    %118 = vector.broadcast %117 : vector<2x1xf32> to vector<2x128xf32>
    %119 = arith.divf %113, %118 : vector<2x128xf32>
    %c0_i32 = arith.constant 0 : i32
    %120 = arith.cmpi eq, %arg0, %c0_i32 : i32
    %121 = arith.extui %120 : i1 to i32
    %c0_i32_50 = arith.constant 0 : i32
    %122 = arith.cmpi ne, %121, %c0_i32_50 : i32
    scf.if %122 {
      %c0_52 = arith.constant 0 : index
      %c0_53 = arith.constant 0 : index
      %126 = vector.load %arg9[%c0_52, %c0_53] : memref<2x128xf32, #tpu.memory_space<vmem>>, vector<2x128xf32>
      tpu.vector_store %arg9[%c0_52, %c0_53], %119 {strides = array<i32>} : memref<2x128xf32, #tpu.memory_space<vmem>>, vector<2x128xf32>,
    } else {
    }
    %c1_i32 = arith.constant 1 : i32
    %123 = arith.cmpi eq, %arg0, %c1_i32 : i32
    %124 = arith.extui %123 : i1 to i32
    %c0_i32_51 = arith.constant 0 : i32
    %125 = arith.cmpi ne, %124, %c0_i32_51 : i32
    scf.if %125 {
      %c0_52 = arith.constant 0 : index
      %c0_53 = arith.constant 0 : index
      %126 = vector.load %arg9[%c0_52, %c0_53] : memref<2x128xf32, #tpu.memory_space<vmem>>, vector<2x128xf32>
      %c5 = arith.constant 5 : index
      %c0_54 = arith.constant 0 : index
      %c0_55 = arith.constant 0 : index
      %127 = vector.load %arg6[%c5, %c0_54, %c0_55] : memref<9x128x128xf32, #tpu.memory_space<vmem>>, vector<1x128x128xf32>
      %128 = vector.shape_cast %127 : vector<1x128x128xf32> to vector<128x128xf32>
      %cst_56 = arith.constant dense<0.000000e+00> : vector<2x128xf32>
      %129 = tpu.matmul %126, %128, %cst_56 {dimension_numbers = #tpu.dot_dimension_numbers<[1], [1], [0], [0], [0, 0, 1, 0], [], []>} : vector<2x128xf32>, vector<128x128xf32>, vector<2x128xf32> -> vector<2x128xf32>
      %c6 = arith.constant 6 : index
      %c0_57 = arith.constant 0 : index
      %c0_58 = arith.constant 0 : index
      %130 = vector.load %arg6[%c6, %c0_57, %c0_58] : memref<9x128x128xf32, #tpu.memory_space<vmem>>, vector<1x128x128xf32>
      %131 = vector.shape_cast %130 : vector<1x128x128xf32> to vector<128x128xf32>
      %cst_59 = arith.constant dense<0.000000e+00> : vector<2x128xf32>
      %132 = tpu.matmul %119, %131, %cst_59 {dimension_numbers = #tpu.dot_dimension_numbers<[1], [1], [0], [0], [0, 0, 1, 0], [], []>} : vector<2x128xf32>, vector<128x128xf32>, vector<2x128xf32> -> vector<2x128xf32>
      %133 = arith.addf %129, %132 : vector<2x128xf32>
      %134 = vector.broadcast %17 : vector<1x128xf32> to vector<2x128xf32>
      %135 = arith.addf %133, %134 : vector<2x128xf32>
      %cst_60 = arith.constant 0.999994993 : f32
      %136 = vector.broadcast %cst_60 : f32 to vector<2x128xf32>
      %137 = arith.mulf %135, %136 : vector<2x128xf32>
      %cst_61 = arith.constant 0.000000e+00 : f32
      %138 = vector.broadcast %cst_61 : f32 to vector<2x128xf32>
      %139 = arith.maximumf %137, %138 : vector<2x128xf32>
      %c7 = arith.constant 7 : index
      %c0_62 = arith.constant 0 : index
      %c0_63 = arith.constant 0 : index
      %140 = vector.load %arg6[%c7, %c0_62, %c0_63] : memref<9x128x128xf32, #tpu.memory_space<vmem>>, vector<1x128x128xf32>
      %141 = vector.shape_cast %140 : vector<1x128x128xf32> to vector<128x128xf32>
      %cst_64 = arith.constant dense<0.000000e+00> : vector<2x128xf32>
      %142 = tpu.matmul %139, %141, %cst_64 {dimension_numbers = #tpu.dot_dimension_numbers<[1], [1], [0], [0], [0, 0, 1, 0], [], []>} : vector<2x128xf32>, vector<128x128xf32>, vector<2x128xf32> -> vector<2x128xf32>
      %143 = vector.broadcast %18 : vector<1x128xf32> to vector<2x128xf32>
      %144 = arith.addf %142, %143 : vector<2x128xf32>
      %cst_65 = arith.constant 0.999994993 : f32
      %145 = vector.broadcast %cst_65 : f32 to vector<2x128xf32>
      %146 = arith.mulf %144, %145 : vector<2x128xf32>
      %cst_66 = arith.constant 0.000000e+00 : f32
      %147 = vector.broadcast %cst_66 : f32 to vector<2x128xf32>
      %148 = arith.maximumf %146, %147 : vector<2x128xf32>
      %c8 = arith.constant 8 : index
      %c0_67 = arith.constant 0 : index
      %c0_68 = arith.constant 0 : index
      %149 = vector.load %arg6[%c8, %c0_67, %c0_68] : memref<9x128x128xf32, #tpu.memory_space<vmem>>, vector<1x128x128xf32>
      %150 = vector.shape_cast %149 : vector<1x128x128xf32> to vector<128x128xf32>
      %cst_69 = arith.constant dense<0.000000e+00> : vector<2x128xf32>
      %151 = tpu.matmul %148, %150, %cst_69 {dimension_numbers = #tpu.dot_dimension_numbers<[1], [1], [0], [0], [0, 0, 1, 0], [], []>} : vector<2x128xf32>, vector<128x128xf32>, vector<2x128xf32> -> vector<2x128xf32>
      %152 = vector.broadcast %19 : vector<1x128xf32> to vector<2x128xf32>
      %153 = arith.addf %151, %152 : vector<2x128xf32>
      %c0_70 = arith.constant 0 : index
      %c0_71 = arith.constant 0 : index
      %154 = vector.load %arg8[%c0_70, %c0_71] : memref<2x128xf32, #tpu.memory_space<vmem>>, vector<2x128xf32>
      tpu.vector_store %arg8[%c0_70, %c0_71], %153 {strides = array<i32>} : memref<2x128xf32, #tpu.memory_space<vmem>>, vector<2x128xf32>,
    } else {
    }
    return
  }
  func.func @transform_0(%arg0: i32) -> (i32, i32, i32) {
    %c0_i32 = arith.constant 0 : i32
    %c0_i32_0 = arith.constant 0 : i32
    %c0_i32_1 = arith.constant 0 : i32
    return %arg0, %c0_i32, %c0_i32_0 : i32, i32, i32
  }
  func.func @transform_1(%arg0: i32) -> (i32, i32, i32) {
    %c0_i32 = arith.constant 0 : i32
    %c0_i32_0 = arith.constant 0 : i32
    %c0_i32_1 = arith.constant 0 : i32
    return %arg0, %c0_i32, %c0_i32_0 : i32, i32, i32
  }
  func.func @transform_2(%arg0: i32) -> (i32, i32, i32) {
    %c0_i32 = arith.constant 0 : i32
    %c0_i32_0 = arith.constant 0 : i32
    %c0_i32_1 = arith.constant 0 : i32
    return %arg0, %c0_i32, %c0_i32_0 : i32, i32, i32
  }
  func.func @transform_3(%arg0: i32) -> (i32, i32, i32) {
    %c0_i32 = arith.constant 0 : i32
    %c0_i32_0 = arith.constant 0 : i32
    %c0_i32_1 = arith.constant 0 : i32
    return %arg0, %c0_i32, %c0_i32_0 : i32, i32, i32
  }
  func.func @transform_4(%arg0: i32) -> (i32, i32) {
    %c0_i32 = arith.constant 0 : i32
    %c0_i32_0 = arith.constant 0 : i32
    %c0_i32_1 = arith.constant 0 : i32
    return %c0_i32, %c0_i32_0 : i32, i32
  }
  func.func @transform_5(%arg0: i32) -> (i32, i32, i32) {
    %c0_i32 = arith.constant 0 : i32
    %c0_i32_0 = arith.constant 0 : i32
    %c0_i32_1 = arith.constant 0 : i32
    %c0_i32_2 = arith.constant 0 : i32
    return %c0_i32, %c0_i32_0, %c0_i32_1 : i32, i32, i32
  }
  func.func @transform_6(%arg0: i32) -> (i32, i32) {
    %c0_i32 = arith.constant 0 : i32
    %c0_i32_0 = arith.constant 0 : i32
    %c0_i32_1 = arith.constant 0 : i32
    return %c0_i32, %c0_i32_0 : i32, i32
  }
  func.func @transform_7(%arg0: i32) -> (i32, i32) {
    %c0_i32 = arith.constant 0 : i32
    %c0_i32_0 = arith.constant 0 : i32
    %c0_i32_1 = arith.constant 0 : i32
    return %c0_i32, %c0_i32_0 : i32, i32
  }
}

</mosaic_0001>

<bundles_post_ra>
// kernel: tpu_custom_call.1
= control target key start
LH: loop header
LB: loop body
LE: loop exit
PB: predicated region body
PF: predicated region fallthrough
CT: control target
= control target key end

     0   :  { %12 = vsyncpa [#allocation4], 0  ;;  %s3069_s0 = inlined_call_operand.vmem [shape: f32[2,8,8], index: 0, kind: input, shape index: {}]   ;;  %s3070_s1 = inlined_call_operand.vmem [shape: bf16[2,8,8], index: 1, kind: input, shape index: {}]   ;;  %s3071_s2 = inlined_call_operand.vmem [shape: f32[2,8,8], index: 2, kind: input, shape index: {}]   ;;  %s3072_s3 = inlined_call_operand.vmem [shape: f32[2,2,8], index: 3, kind: input, shape index: {}]   ;;  %s3073_s4 = inlined_call_operand.vmem [shape: f32[128,8], index: 4, kind: input, shape index: {}]   ;;  %s3074_s5 = inlined_call_operand.hbm [shape: f32[9,128,128], index: 5, kind: input, shape index: {}]   ;;  %s3075_s6 = inlined_call_operand.vmem [shape: f32[16,128], index: 6, kind: input, shape index: {}]   ;;  %s3076_s7 = inlined_call_operand.hbm [shape: f32[2,128], index: 7, kind: output, shape index: {}]  }
   0x1   :  { %13 = vsyncpa [#allocation5], 0  ;;  %s2727_s24 = smov 0  }
   0x2 LB: > { %s2733_s25 = sadd.s32 4294967295, %s2673_s24   ;;  %p1720_p0 = scmp.ge.s32.totalorder %s2673_s24, 1  ;;  %s2673_s24 = sphi %s2727_s24, %s19_s24  }
   0x3   : > { %p212_p1 = scmp.lt.s32.totalorder %s2673_s24, 3  ;;  %s2675_s26 = smov [#allocation3]  }
   0x4   : > { %s227_s27 = sshll.u32 %s2675_s26, 4  ;;  %p3077_p4 = scmp.eq.s32.totalorder %s2733_s25, 0  ;;  %s228_s27 = int_to_ptr.vmem [resolvable:$true] %s227_s27 }
   0x5   : > { %p2738_p3 = pnand %p1720_p0, %p212_p1  ;;  %s2605_s9 = scalar_lea.hbm %s3074_s5, 18432 }
   0x6   : > { %p2606_p7 = scmp.ne.s32.totalorder %s3074_s5, %s2605_s9  ;;  %p2612_p11 = scmp.lt.u32.totalorder %s2605_s9, %s3074_s5 }
   0x7   : > { %s3079_s28 = scalar_select %p2738_p3, 1, 0 }
   0x8   : > { %p2565_p5 = pneg %p2738_p3 }
   0xa   : > { %p2747_p6 = pnand %p3077_p4, %p2565_p5 }
   0xc   : > { %p2607_p8 = pneg %p2747_p6 }
   0xe   : > { %p2608_p9 = pnand %p2607_p8, %p2606_p7 }
  0x10   : > { %p2609_p10 = pneg %p2608_p9 }
  0x12   : > { %p2614_p12 = pnand %p2612_p11, %p2609_p10 }
  0x14   : > { %2617 = shalt.err (!%p2614_p12)
}
  0x15   : > { %s2618_s14 = scalar_lea.vmem %s228_s27, 18432  ;;  %p2626_p5 = scmp.lt.s32.totalorder %s228_s27, %s228_s27 }
  0x16   : > { %p2619_p13 = scmp.ne.s32.totalorder %s228_s27, %s2618_s14  ;;  %p2627_p2 = scmp.lt.s32.totalorder %s2618_s14, %s2618_s14 }
  0x18   : > { %p2621_p0 = pnand %p2619_p13, %p2607_p8  ;;  %p2628_p4 = por %p2627_p2, %p2626_p5 }
  0x1a   : > { %p2622_p1 = pneg %p2621_p0 }
  0x1c   : > { %p2629_p3 = pnand %p2628_p4, %p2622_p1 }
  0x1e   : > { %2632 = shalt.err (!%p2629_p3)
}
  0x1f   : > { %s2676_s15 = smov 128   ;;  %s2677_s16 = smov 8  }
  0x20   : > { %2568 = dma.hbm_to_vmem [thread:$0]  (!%p2747_p6), %s3074_s5, 18432, %s228_s27, [#allocation4], %s2676_s15, %s2676_s15, %s2677_s16  }
  0x21   : > { %p3081_p7 = scmp.ne.s32.totalorder %s3079_s28, 0 }
  0x22   : > { %p3082_p9 = scmp.eq.s32.totalorder (!%p3081_p7), %s2733_s25, 0 }
  0x23   : > { %274 = sbr.rel (%p3081_p7) target bundleno = 3434 (0xd6a), region = 48 }
  0x2a   : > { %2664 = dma.done.wait (%p3082_p9), [#allocation4], 18432   ;;  %p3083_p8 = pmov %p3082_p9 }
  0x2b   : > { %v2678_v0 = vmov 0.0|0.0   ;;  %vm2679_vm0 = vmmov 0   ;;  %v2680_v1 = vmov 0.0   ;;  %p312_p2 = scmp.lt.s32.totalorder %s2733_s25, 1  ;;  %vm338_vm1 = vcmask 64512   ;;  %v343_v2 = vld [vmem:[%s3073_s4] sm:$0xff] }
  0x2c   : > { %2666 = vsyncadd (%p3083_p8), [#allocation4], 4294948864  ;;  %2305 = vmatprep.subr.bf16.mxu0 %v2678_v0  ;;  %1965 = vmatprep.mubr.msk.f32.mxu0 %vm2679_vm0, %v2680_v1  ;;  %v344_v3 = vld [vmem:[%s3073_s4 + $0x8] sm:$0xff]  ;;  %v345_v6 = vld [vmem:[%s3073_s4 + $0x10] sm:$0xff]  ;;  %vm485_vm3 = vcmask 1043456   ;;  %v530_v62 = vlaneseq  ;;  %s2681_s26 = smov 127  }
  0x2d   : > { %1968 = vmatprep.subr.bf16.mxu1 %v2680_v1  ;;  %1970 = vmatprep.mubr.msk.bf16.mxu1 %vm2679_vm0, %v2680_v1  ;;  %s2781_s19 = scalar_select %p312_p2, %s2733_s25, 1  ;;  %vm2792_vm2 = vmpackc.low %vm338_vm1, %vm338_vm1  ;;  %v2306_v5 = vpack.c.bf16 %v344_v3, %v343_v2  ;;  %v346_v7 = vld [vmem:[%s3073_s4 + $0x18] sm:$0xff]  ;;  %v347_v12 = vld [vmem:[%s3073_s4 + $0x20] sm:$0xff]  ;;  %vm1242_vm9 = vcmask 58368  }
  0x2e   : > { %v2310_v10 = vpack.c.bf16 %v346_v7, %v345_v6  ;;  %v348_v13 = vld [vmem:[%s3073_s4 + $0x28] sm:$0xff]  ;;  %v349_v15 = vld [vmem:[%s3073_s4 + $0x30] sm:$0xff]  ;;  %v350_v16 = vld [vmem:[%s3073_s4 + $0x38] sm:$0xff]  ;;  %v2892_v63 = vshrl.u32 %v530_v62, 7  ;;  %p3086_p3 = scmp.ne.s32.totalorder %s2733_s25, 0 }
  0x2f   : > { %s1726_s20 = sshll.u32 %s2781_s19, 2  ;;  %2308 = vmatpush3.bf16.xpose.msk.msra.mxu0 %vm2792_vm2, %v2306_v5  ;;  %v2314_v14 = vpack.c.bf16 %v348_v13, %v347_v12  ;;  %v2318_v17 = vpack.c.bf16 %v350_v16, %v349_v15  ;;  %v351_v18 = vld [vmem:[%s3073_s4 + $0x40] sm:$0xff]  ;;  %v352_v19 = vld [vmem:[%s3073_s4 + $0x48] sm:$0xff]  ;;  %v353_v21 = vld [vmem:[%s3073_s4 + $0x50] sm:$0xff]  ;;  %s1725_s15 = sshll.u32 %s2781_s19, 3 }
  0x30   : > { %s319_s29 = scalar_lea.vmem %s3070_s1, %s1726_s20  ;;  %2309 = vmatprep.subr.bf16.mxu0 %v2678_v0  ;;  %v2322_v20 = vpack.c.bf16 %v352_v19, %v351_v18  ;;  %v354_v22 = vld [vmem:[%s3073_s4 + $0x58] sm:$0xff]  ;;  %v355_v24 = vld [vmem:[%s3073_s4 + $0x60] sm:$0xff]  ;;  %v356_v25 = vld [vmem:[%s3073_s4 + $0x68] sm:$0xff]  ;;  %s315_s18 = scalar_lea.vmem %s3069_s0, %s1725_s15  ;;  %v2895_v2 = vsub.s32 0, %v2892_v63 }
  0x31   : > { %v2808_v8 = vld [vmem:[%s319_s29] sm:$0xf]  ;;  %v2326_v23 = vpack.c.bf16 %v354_v22, %v353_v21  ;;  %v2330_v26 = vpack.c.bf16 %v356_v25, %v355_v24  ;;  %v357_v27 = vld [vmem:[%s3073_s4 + $0x70] sm:$0xff]  ;;  %v358_v28 = vld [vmem:[%s3073_s4 + $0x78] sm:$0xff]  ;;  %s323_s29 = scalar_lea.vmem %s3071_s2, %s1725_s15  ;;  %s1728_s9 = sshll.u32 %s2781_s19, 1 }
  0x32   : > { %v337_v9 = vunpack.c.l.bf16 %v2808_v8  ;;  %v2334_v29 = vpack.c.bf16 %v358_v28, %v357_v27  ;;  %v331_v30 = vld [vmem:[%s315_s18] sm:$0xff]  ;;  %v536_v39 = vld [vmem:[#allocation3 + $0x8] sm:$0xff]  ;;  %v537_v41 = vld [vmem:[#allocation3 + $0x10] sm:$0xff]  ;;  %vm715_vm4 = vcmp.gt.bf16.partialorder %v2808_v8, 0  ;;  %s327_s12 = scalar_lea.vmem %s3072_s3, %s1728_s9 }
  0x33   : > { %v535_v38 = vld [vmem:[#allocation3] sm:$0xff]  ;;  %v538_v42 = vld [vmem:[#allocation3 + $0x18] sm:$0xff]  ;;  %v540_v45 = vld [vmem:[#allocation3 + $0x28] sm:$0xff] }
  0x34   : > { %v339_v11 = vsel %vm338_vm1, %v337_v9, 0.0  ;;  %v2338_v40 = vpack.c.bf16 %v536_v39, %v535_v38  ;;  %v2341_v43 = vpack.c.bf16 %v538_v42, %v537_v41  ;;  %v539_v44 = vld [vmem:[#allocation3 + $0x20] sm:$0xff]  ;;  %v541_v47 = vld [vmem:[#allocation3 + $0x30] sm:$0xff]  ;;  %v542_v48 = vld [vmem:[#allocation3 + $0x38] sm:$0xff] }
  0x35   : > { %340 = vadd.xlane.f32.xlu0 %v339_v11  ;;  %v2344_v46 = vpack.c.bf16 %v540_v45, %v539_v44  ;;  %v2347_v49 = vpack.c.bf16 %v542_v48, %v541_v47  ;;  %v543_v50 = vld [vmem:[#allocation3 + $0x40] sm:$0xff]  ;;  %v544_v51 = vld [vmem:[#allocation3 + $0x48] sm:$0xff]  ;;  %v545_v53 = vld [vmem:[#allocation3 + $0x50] sm:$0xff] }
  0x36   : > { %v2350_v52 = vpack.c.bf16 %v544_v51, %v543_v50  ;;  %v546_v54 = vld [vmem:[#allocation3 + $0x58] sm:$0xff]  ;;  %v547_v56 = vld [vmem:[#allocation3 + $0x60] sm:$0xff]  ;;  %v548_v57 = vld [vmem:[#allocation3 + $0x68] sm:$0xff] }
  0x37   : > { %2312 = vmatpush3.bf16.xpose.msk.msra.mxu0 %vm2792_vm2, %v2310_v10  ;;  %v2353_v55 = vpack.c.bf16 %v546_v54, %v545_v53  ;;  %v2356_v58 = vpack.c.bf16 %v548_v57, %v547_v56  ;;  %v549_v59 = vld [vmem:[#allocation3 + $0x70] sm:$0xff]  ;;  %v550_v60 = vld [vmem:[#allocation3 + $0x78] sm:$0xff]  ;;  %v2909_v12 = vld [vmem:[%s3075_s6 + $0x8] sm:$0xff] }
  0x38   : > { %2313 = vmatprep.subr.bf16.mxu0 %v2678_v0  ;;  %v2359_v61 = vpack.c.bf16 %v550_v60, %v549_v59  ;;  %v2900_v3 = vld [vmem:[%s3075_s6] sm:$0xff]  ;;  %v707_v13 = vrot.slane %v2909_v12, 3  ;;  %v788_v44 = vld [vmem:[#allocation3 + $0x88] sm:$0xff] }
  0x39   : > { %v533_v4 = vrot.slane %v2900_v3, %v2895_v2  ;;  %v790_v47 = vld [vmem:[#allocation3 + $0x98] sm:$0xff]  ;;  %v792_v50 = vld [vmem:[#allocation3 + $0xa8] sm:$0xff] }
  0x3a   : > { %v794_v53 = vld [vmem:[#allocation3 + $0xb8] sm:$0xff]  ;;  %v796_v56 = vld [vmem:[#allocation3 + $0xc8] sm:$0xff] }
  0x3b   : > { %v798_v59 = vld [vmem:[#allocation3 + $0xd8] sm:$0xff]  ;;  %v800_v62 = vld [vmem:[#allocation3 + $0xe8] sm:$0xff] }
  0x3f   : > { %2316 = vmatpush3.bf16.xpose.msk.msra.mxu0 %vm2792_vm2, %v2314_v14  ;;  %v623_v14 = vsub.s32 3, %v2892_v63 }
  0x40   : > { %2317 = vmatprep.subr.bf16.mxu0 %v2678_v0 }
  0x41   : > { %v624_v15 = vrot.slane %v2900_v3, %v623_v14 }
  0x47   : > { %2320 = vmatpush3.bf16.xpose.msk.msra.mxu0 %vm2792_vm2, %v2318_v17  ;;  %v629_v17 = vrot.slane %v2900_v3, 2 }
  0x48   : > { %2321 = vmatprep.subr.bf16.mxu0 %v2678_v0 }
  0x4b   : > { %708 = vrot.lane.b32.xlu0 %v707_v13, %s2681_s26 }
  0x4f   : > { %2324 = vmatpush3.bf16.xpose.msk.msra.mxu0 %vm2792_vm2, %v2322_v20 }
  0x50   : > { %2325 = vmatprep.subr.bf16.mxu0 %v2678_v0 }
  0x57   : > { %2328 = vmatpush3.bf16.xpose.msk.msra.mxu0 %vm2792_vm2, %v2326_v23  ;;  %v333_v23 = vld [vmem:[%s323_s29] sm:$0xff] }
  0x58   : > { %2329 = vmatprep.subr.bf16.mxu0 %v2678_v0 }
  0x5f   : > { %2332 = vmatpush3.bf16.xpose.msk.msra.mxu0 %vm2792_vm2, %v2330_v26  ;;  %v2682_v26 = vmov 0  }
  0x60   : > { %2333 = vmatprep.subr.bf16.mxu0 %v2678_v0  ;;  %v719_v27 = vsel %vm715_vm4, 65537, %v2682_v26  ;;  %v892_v26 = vld [vmem:[#allocation3 + $0x140] sm:$0xff] }
  0x67   : > { %2336 = vmatpush3.bf16.xpose.msk.msra.mxu0 %vm2792_vm2, %v2334_v29 }
  0x68   : > { %2009 = vmatprep.subr.mxu0 %v2680_v1 }
  0x6e   : > { %1966 = vmatmul.mubr.msk.f32.vlgmr.msra.gmra.mrb[0].mxu0 %vm338_vm1, %v331_v30 }
  0x6f   : > { %2011 = vmatprep.mubr.msk.f32.mxu0 %vm2679_vm0, %v2680_v1 }
  0xc2   : > { %v341_v31 = vpop.xlane.xlu0 %340 }
  0xc3   : > { %2593 = vrsqrt.f32 %v341_v31 }
  0xc6   : > { %v709_v22 = vpop.permute.xlu0 %708 }
  0xc7   : > { %2553 = vpush %v709_v22 }
  0xc8   : > { %2555 = vpush %v707_v13 }
  0xcd   : > { %v2594_v32 = vpop.eup %2593 }
  0xf8   : > { %s2554_s30 = spop %2553 }
  0xf9   : > { %v711_v24 = vstv %s2554_s30  ;;  %s2556_s8 = spop %2555 }
  0xfa   : > { %v713_v30 = vmul.f32 %v711_v24, %v333_v23  ;;  %v890_v23 = vld [vmem:[#allocation3 + $0x130] sm:$0xff]  ;;  %v891_v24 = vld [vmem:[#allocation3 + $0x138] sm:$0xff] }
 0x141   : > { %v476_v33 = vpop.f32.mrb[0].mxu0 }
 0x142   : > { %v480_v34 = vmul.f32 %v2594_v32, %v476_v33  ;;  %v1967_v35 = vpop.f32.mrb[1].mxu0  ;;  %v720_v33 = vunpack.c.l.b16 %v719_v27  ;;  %v893_v27 = vld [vmem:[#allocation3 + $0x148] sm:$0xff] }
 0x144   : > { %v481_v36 = vpack.c.bf16 %v480_v34, %v480_v34  ;;  %vm721_vm6 = vcmp.ne.s32.totalorder %v720_v33, 0  ;;  %v897_v33 = vld [vmem:[#allocation3 + $0x168] sm:$0xff] }
 0x146   : > { %v487_v37 = vsel %vm485_vm3, %v481_v36, 0 }
 0x147   : > { %1969 = vmatpush3.bf16.msra.mxu1 %v487_v37 }
 0x148   : > { %2337 = vmatprep.subr.bf16.mxu1 %v2678_v0 }
 0x14a   : > { %1971 = vmatmul.mubr.msk.bf16.vlgmr.msra.gmra.mrb[0].mxu1 %vm338_vm1, %v2808_v8 }
 0x14b   : > { %2006 = vmatprep.mubr.msk.f32.mxu1 %vm2679_vm0, %v2680_v1 }
 0x150   : > { %2339 = vmatpush3.bf16.xpose.msra.mxu1 %v2338_v40 }
 0x151   : > { %2340 = vmatprep.subr.bf16.mxu1 %v2678_v0 }
 0x158   : > { %2342 = vmatpush3.bf16.xpose.msra.mxu1 %v2341_v43  ;;  %v787_v43 = vld [vmem:[#allocation3 + $0x80] sm:$0xff] }
 0x159   : > { %2343 = vmatprep.subr.bf16.mxu1 %v2678_v0  ;;  %v2362_v45 = vpack.c.bf16 %v788_v44, %v787_v43  ;;  %v902_v44 = vsub.s32 5, %v2892_v63 }
 0x160   : > { %2345 = vmatpush3.bf16.xpose.msra.mxu1 %v2344_v46  ;;  %v789_v46 = vld [vmem:[#allocation3 + $0x90] sm:$0xff] }
 0x161   : > { %2346 = vmatprep.subr.bf16.mxu1 %v2678_v0  ;;  %v2365_v48 = vpack.c.bf16 %v790_v47, %v789_v46 }
 0x168   : > { %2348 = vmatpush3.bf16.xpose.msra.mxu1 %v2347_v49  ;;  %v791_v49 = vld [vmem:[#allocation3 + $0xa0] sm:$0xff] }
 0x169   : > { %2349 = vmatprep.subr.bf16.mxu1 %v2678_v0  ;;  %v2368_v51 = vpack.c.bf16 %v792_v50, %v791_v49 }
 0x170   : > { %2351 = vmatpush3.bf16.xpose.msra.mxu1 %v2350_v52  ;;  %v793_v52 = vld [vmem:[#allocation3 + $0xb0] sm:$0xff] }
 0x171   : > { %2352 = vmatprep.subr.bf16.mxu1 %v2678_v0  ;;  %v2371_v54 = vpack.c.bf16 %v794_v53, %v793_v52  ;;  %v986_v52 = vld [vmem:[#allocation3 + $0x188] sm:$0xff] }
 0x178   : > { %2354 = vmatpush3.bf16.xpose.msra.mxu1 %v2353_v55  ;;  %v795_v55 = vld [vmem:[#allocation3 + $0xc0] sm:$0xff] }
 0x179   : > { %2355 = vmatprep.subr.bf16.mxu1 %v2678_v0  ;;  %v2374_v57 = vpack.c.bf16 %v796_v56, %v795_v55  ;;  %v988_v55 = vld [vmem:[#allocation3 + $0x198] sm:$0xff] }
 0x180   : > { %2357 = vmatpush3.bf16.xpose.msra.mxu1 %v2356_v58  ;;  %v797_v58 = vld [vmem:[#allocation3 + $0xd0] sm:$0xff] }
 0x181   : > { %2358 = vmatprep.subr.bf16.mxu1 %v2678_v0  ;;  %v2377_v60 = vpack.c.bf16 %v798_v59, %v797_v58  ;;  %v990_v58 = vld [vmem:[#allocation3 + $0x1a8] sm:$0xff] }
 0x188   : > { %2360 = vmatpush3.bf16.xpose.msra.mxu1 %v2359_v61  ;;  %v799_v61 = vld [vmem:[#allocation3 + $0xe0] sm:$0xff] }
 0x189   : > { %2361 = vmatprep.subr.bf16.mxu1 %v2678_v0 }
 0x21d   : > { %v523_v5 = vpop.f32.mrb[0].mxu1 }
 0x21e   : > { %v529_v6 = vmul.f32 %v2594_v32, %v523_v5  ;;  %v1972_v7 = vpop.f32.mrb[1].mxu1  ;;  %v801_v5 = vld [vmem:[#allocation3 + $0xf0] sm:$0xff] }
 0x21f   : > { %v526_v9 = vpop.f32.mrb[2].mxu1 }
 0x220   : > { %v534_v10 = vadd.f32 %v533_v4, %v529_v6  ;;  %v1973_v11 = vpop.f32.mrb[3].mxu1  ;;  %v2380_v4 = vpack.c.bf16 %v800_v62, %v799_v61  ;;  %v802_v6 = vld [vmem:[#allocation3 + $0xf8] sm:$0xff] }
 0x221   : > { %v2383_v7 = vpack.c.bf16 %v802_v6, %v801_v5  ;;  %v885_v11 = vld [vmem:[#allocation3 + $0x108] sm:$0xff]  ;;  %v992_v61 = vld [vmem:[#allocation3 + $0x1b8] sm:$0xff] }
 0x222   : > { %2007 = vmatmul.mubr.f32.vlgmr.msra.gmra.mrb[4].mxu1 %v534_v10  ;;  %v884_v10 = vld [vmem:[#allocation3 + $0x100] sm:$0xff]  ;;  %v994_v5 = vld [vmem:[#allocation3 + $0x1c8] sm:$0xff] }
 0x223   : > { %2052 = vmatprep.mubr.msk.f32.mxu1 %vm2679_vm0, %v2680_v1  ;;  %2363 = vmatpush3.bf16.xpose.msra.mxu1 %v2362_v45  ;;  %v903_v45 = vrot.slane %v2900_v3, %v902_v44  ;;  %v1094_v44 = vld [vmem:[#allocation3 + $0x278] sm:$0xff] }
 0x224   : > { %2364 = vmatprep.subr.bf16.mxu1 %v2678_v0 }
 0x22b   : > { %2366 = vmatpush3.bf16.xpose.msra.mxu1 %v2365_v48 }
 0x22c   : > { %2367 = vmatprep.subr.bf16.mxu1 %v2678_v0 }
 0x233   : > { %2369 = vmatpush3.bf16.xpose.msra.mxu1 %v2368_v51  ;;  %v985_v51 = vld [vmem:[#allocation3 + $0x180] sm:$0xff] }
 0x234   : > { %2370 = vmatprep.subr.bf16.mxu1 %v2678_v0  ;;  %v2410_v53 = vpack.c.bf16 %v986_v52, %v985_v51  ;;  %v879_v51 = vstv %s2556_s8 }
 0x23b   : > { %2372 = vmatpush3.bf16.xpose.msra.mxu1 %v2371_v54  ;;  %v987_v54 = vld [vmem:[#allocation3 + $0x190] sm:$0xff] }
 0x23c   : > { %2373 = vmatprep.subr.bf16.mxu1 %v2678_v0  ;;  %v2413_v56 = vpack.c.bf16 %v988_v55, %v987_v54 }
 0x243   : > { %2375 = vmatpush3.bf16.xpose.msra.mxu1 %v2374_v57  ;;  %v989_v57 = vld [vmem:[#allocation3 + $0x1a0] sm:$0xff] }
 0x244   : > { %2376 = vmatprep.subr.bf16.mxu1 %v2678_v0  ;;  %v2416_v59 = vpack.c.bf16 %v990_v58, %v989_v57 }
 0x24b   : > { %2378 = vmatpush3.bf16.xpose.msra.mxu1 %v2377_v60  ;;  %v991_v60 = vld [vmem:[#allocation3 + $0x1b0] sm:$0xff] }
 0x24c   : > { %2379 = vmatprep.subr.bf16.mxu1 %v2678_v0  ;;  %v2419_v62 = vpack.c.bf16 %v992_v61, %v991_v60 }
 0x253   : > { %2381 = vmatpush3.bf16.xpose.msra.mxu1 %v2380_v4  ;;  %v993_v4 = vld [vmem:[#allocation3 + $0x1c0] sm:$0xff] }
 0x254   : > { %2382 = vmatprep.subr.bf16.mxu1 %v2678_v0  ;;  %v2422_v6 = vpack.c.bf16 %v994_v5, %v993_v4 }
 0x25b   : > { %2384 = vmatpush3.bf16.xpose.msra.mxu1 %v2383_v7  ;;  %v995_v7 = vld [vmem:[#allocation3 + $0x1d0] sm:$0xff] }
 0x25c   : > { %2409 = vmatprep.subr.bf16.mxu1 %v2678_v0 }
 0x2f5   : > { %v617_v16 = vpop.f32.mrb[4].mxu1 }
 0x2f6   : > { %v735_v18 = vpack.c.bf16 %v617_v16, %v617_v16  ;;  %v2008_v19 = vpop.f32.mrb[5].mxu1  ;;  %2010 = vmatpush3.xpose.msra.mxu0 %v617_v16  ;;  %v625_v20 = vmul.f32 %v624_v15, %v617_v16  ;;  %v2386_v15 = vpack.c.bf16 %v885_v11, %v884_v10 }
 0x2f7   : > { %2014 = vmatprep.subr.bf16.mxu0 %v2680_v1 }
 0x2f8   : > { %626 = vadd.xlane.f32.xlu1 %v625_v20  ;;  %v744_v21 = vsel %vm485_vm3, %v735_v18, 0  ;;  %v887_v18 = vld [vmem:[#allocation3 + $0x118] sm:$0xff]  ;;  %v888_v20 = vld [vmem:[#allocation3 + $0x120] sm:$0xff] }
 0x2f9   : > { %2012 = vmatmul.mubr.f32.vlgmr.msra.gmra.mrb[2].mxu0 %v629_v17  ;;  %v886_v17 = vld [vmem:[#allocation3 + $0x110] sm:$0xff] }
 0x2fa   : > { %2015 = vmatpush3.bf16.msra.mxu0 %v744_v21  ;;  %2016 = vmatprep.mubr.msk.bf16.mxu0 %vm2679_vm0, %v2680_v1  ;;  %v2389_v19 = vpack.c.bf16 %v887_v18, %v886_v17  ;;  %v889_v21 = vld [vmem:[#allocation3 + $0x128] sm:$0xff] }
 0x2fb   : > { %2385 = vmatprep.subr.bf16.mxu0 %v2678_v0  ;;  %v2392_v22 = vpack.c.bf16 %v889_v21, %v888_v20  ;;  %v998_v17 = vld [vmem:[#allocation3 + $0x1e8] sm:$0xff]  ;;  %v1000_v20 = vld [vmem:[#allocation3 + $0x1f8] sm:$0xff] }
 0x385   : > { %v627_v31 = vpop.xlane.xlu1 %626 }
 0x3cc   : > { %v697_v25 = vpop.f32.mrb[2].mxu0 }
 0x3cd   : > { %v704_v28 = vrot.slane %v697_v25, %v2895_v2  ;;  %v2013_v29 = vpop.f32.mrb[3].mxu0  ;;  %v2395_v25 = vpack.c.bf16 %v891_v24, %v890_v23  ;;  %v1080_v23 = vld [vmem:[#allocation3 + $0x208] sm:$0xff] }
 0x3ce   : > { %v894_v29 = vld [vmem:[#allocation3 + $0x150] sm:$0xff] }
 0x3cf   : > { %v705_v32 = vadd.f32 %v704_v28, %v627_v31  ;;  %v2398_v28 = vpack.c.bf16 %v893_v27, %v892_v26  ;;  %v1082_v26 = vld [vmem:[#allocation3 + $0x218] sm:$0xff] }
 0x3d1   : > { %v714_v34 = vadd.f32 %v713_v30, %v705_v32  ;;  %v895_v30 = vld [vmem:[#allocation3 + $0x158] sm:$0xff]  ;;  %v896_v32 = vld [vmem:[#allocation3 + $0x160] sm:$0xff] }
 0x3d2   : > { %v2401_v31 = vpack.c.bf16 %v895_v30, %v894_v29  ;;  %v1084_v29 = vld [vmem:[#allocation3 + $0x228] sm:$0xff] }
 0x3d3   : > { %vm716_vm5 = vcmp.ge.f32.partialorder %v714_v34, 0.0  ;;  %v717_v35 = vmul.f32 0.2, %v714_v34 }
 0x3d5   : > { %v718_v36 = vsel %vm716_vm5, %v714_v34, %v717_v35  ;;  %v2404_v34 = vpack.c.bf16 %v897_v33, %v896_v32  ;;  %v898_v35 = vld [vmem:[#allocation3 + $0x170] sm:$0xff]  ;;  %v1086_v32 = vld [vmem:[#allocation3 + $0x238] sm:$0xff] }
 0x3d6   : > { %v722_v37 = vsel %vm721_vm6, %v718_v36, -1e+30  ;;  %v899_v36 = vld [vmem:[#allocation3 + $0x178] sm:$0xff] }
 0x3d7   : > { %v723_v8 = vsel %vm338_vm1, %v722_v37, -inf }
 0x3d8   : > { %724 = vmax.xlane.f32.xlu1 %v723_v8  ;;  %v738_v8 = vsub.s32 1, %v2892_v63 }
 0x465   : > { %v725_v38 = vpop.xlane.xlu1 %724 }
 0x466   : > { %v726_v39 = vsub.f32 %v722_v37, %v725_v38  ;;  %v2407_v37 = vpack.c.bf16 %v899_v36, %v898_v35  ;;  %v739_v38 = vrot.slane %v2900_v3, %v738_v8  ;;  %v1088_v35 = vld [vmem:[#allocation3 + $0x248] sm:$0xff] }
 0x468   : > { %v727_v40 = vmul.f32 1.442695, %v726_v39 }
 0x46a   : > { %2595 = vpow2.f32 %v727_v40 }
 0x474   : > { %v2596_v41 = vpop.eup %2595 }
 0x475   : > { %v729_v42 = vsel %vm338_vm1, %v2596_v41, 0.0 }
 0x476   : > { %730 = vadd.xlane.f32.xlu1 %v729_v42 }
 0x503   : > { %v731_v9 = vpop.xlane.xlu1 %730 }
 0x504   : > { %2597 = vrcp.f32 %v731_v9  ;;  %v996_v9 = vld [vmem:[#allocation3 + $0x1d8] sm:$0xff] }
 0x505   : > { %v2425_v10 = vpack.c.bf16 %v996_v9, %v995_v7 }
 0x50e   : > { %v2598_v13 = vpop.eup %2597 }
 0x50f   : > { %v733_v14 = vmul.f32 %v2598_v13, %v2596_v41 }
 0x511   : > { %v734_v16 = vpack.c.bf16 %v733_v14, %v733_v14 }
 0x513   : > { %2017 = vmatmul.mubr.msk.bf16.vlgmr.msra.gmra.mrb[4].mxu0 %vm338_vm1, %v734_v16  ;;  %v997_v16 = vld [vmem:[#allocation3 + $0x1e0] sm:$0xff] }
 0x514   : > { %2387 = vmatpush3.bf16.xpose.msra.mxu0 %v2386_v15  ;;  %2087 = vmatprep.mubr.msk.f32.mxu0 %vm2679_vm0, %v2680_v1  ;;  %v2428_v18 = vpack.c.bf16 %v998_v17, %v997_v16 }
 0x515   : > { %2388 = vmatprep.subr.bf16.mxu0 %v2678_v0 }
 0x51c   : > { %2390 = vmatpush3.bf16.xpose.msra.mxu0 %v2389_v19  ;;  %v999_v19 = vld [vmem:[#allocation3 + $0x1f0] sm:$0xff] }
 0x51d   : > { %2391 = vmatprep.subr.bf16.mxu0 %v2678_v0  ;;  %v2431_v21 = vpack.c.bf16 %v1000_v20, %v999_v19 }
 0x524   : > { %2393 = vmatpush3.bf16.xpose.msra.mxu0 %v2392_v22  ;;  %v1079_v22 = vld [vmem:[#allocation3 + $0x200] sm:$0xff] }
 0x525   : > { %2394 = vmatprep.subr.bf16.mxu0 %v2678_v0  ;;  %v2434_v24 = vpack.c.bf16 %v1080_v23, %v1079_v22 }
 0x52c   : > { %2396 = vmatpush3.bf16.xpose.msra.mxu0 %v2395_v25  ;;  %v1081_v25 = vld [vmem:[#allocation3 + $0x210] sm:$0xff] }
 0x52d   : > { %2397 = vmatprep.subr.bf16.mxu0 %v2678_v0  ;;  %v2437_v27 = vpack.c.bf16 %v1082_v26, %v1081_v25 }
 0x534   : > { %2399 = vmatpush3.bf16.xpose.msra.mxu0 %v2398_v28  ;;  %v1083_v28 = vld [vmem:[#allocation3 + $0x220] sm:$0xff] }
 0x535   : > { %2400 = vmatprep.subr.bf16.mxu0 %v2678_v0  ;;  %v2440_v30 = vpack.c.bf16 %v1084_v29, %v1083_v28 }
 0x53c   : > { %2402 = vmatpush3.bf16.xpose.msra.mxu0 %v2401_v31  ;;  %v1085_v31 = vld [vmem:[#allocation3 + $0x230] sm:$0xff] }
 0x53d   : > { %2403 = vmatprep.subr.bf16.mxu0 %v2678_v0  ;;  %v2443_v33 = vpack.c.bf16 %v1086_v32, %v1085_v31 }
 0x544   : > { %2405 = vmatpush3.bf16.xpose.msra.mxu0 %v2404_v34  ;;  %v1087_v34 = vld [vmem:[#allocation3 + $0x240] sm:$0xff] }
 0x545   : > { %2406 = vmatprep.subr.bf16.mxu0 %v2678_v0  ;;  %v2446_v36 = vpack.c.bf16 %v1088_v35, %v1087_v34 }
 0x54c   : > { %2408 = vmatpush3.bf16.xpose.msra.mxu0 %v2407_v37  ;;  %v1089_v37 = vld [vmem:[#allocation3 + $0x250] sm:$0xff] }
 0x54d   : > { %2433 = vmatprep.subr.bf16.mxu0 %v2678_v0 }
 0x5e6   : > { %v780_v39 = vpop.f32.mrb[4].mxu0 }
 0x5e7   : > { %v781_v40 = vadd.f32 %v780_v39, %v739_v38  ;;  %v2018_v41 = vpop.f32.mrb[5].mxu0  ;;  %v1090_v38 = vld [vmem:[#allocation3 + $0x258] sm:$0xff] }
 0x5e8   : > { %v783_v42 = vpop.f32.mrb[6].mxu0  ;;  %v2449_v39 = vpack.c.bf16 %v1090_v38, %v1089_v37  ;;  %v1092_v41 = vld [vmem:[#allocation3 + $0x268] sm:$0xff] }
 0x5e9   : > { %v2019_v43 = vpop.f32.mrb[7].mxu0  ;;  %2053 = vmatmul.mubr.f32.vlgmr.msra.gmra.mrb[6].mxu1 %v781_v40  ;;  %2088 = vmatmul.mubr.f32.vlgmr.msra.gmra.mrb[8].mxu0 %v781_v40  ;;  %v1091_v40 = vld [vmem:[#allocation3 + $0x260] sm:$0xff] }
 0x5ea   : > { %2122 = vmatprep.mubr.msk.f32.mxu1 %vm2679_vm0, %v2680_v1  ;;  %2157 = vmatprep.mubr.msk.f32.mxu0 %vm2679_vm0, %v2680_v1  ;;  %v2452_v42 = vpack.c.bf16 %v1092_v41, %v1091_v40  ;;  %v1093_v43 = vld [vmem:[#allocation3 + $0x270] sm:$0xff] }
 0x5eb   : > { %2411 = vmatpush3.bf16.xpose.msra.mxu1 %v2410_v53  ;;  %2435 = vmatpush3.bf16.xpose.msra.mxu0 %v2434_v24 }
 0x5ec   : > { %2412 = vmatprep.subr.bf16.mxu1 %v2678_v0  ;;  %2436 = vmatprep.subr.bf16.mxu0 %v2678_v0 }
 0x5f3   : > { %2414 = vmatpush3.bf16.xpose.msra.mxu1 %v2413_v56  ;;  %2438 = vmatpush3.bf16.xpose.msra.mxu0 %v2437_v27  ;;  %v1003_v56 = vsub.s32 6, %v2892_v63 }
 0x5f4   : > { %2415 = vmatprep.subr.bf16.mxu1 %v2678_v0  ;;  %2439 = vmatprep.subr.bf16.mxu0 %v2678_v0 }
 0x5f5   : > { %v1004_v57 = vrot.slane %v2900_v3, %v1003_v56 }
 0x5fb   : > { %2417 = vmatpush3.bf16.xpose.msra.mxu1 %v2416_v59  ;;  %2441 = vmatpush3.bf16.xpose.msra.mxu0 %v2440_v30 }
 0x5fc   : > { %2418 = vmatprep.subr.bf16.mxu1 %v2678_v0  ;;  %2442 = vmatprep.subr.bf16.mxu0 %v2678_v0 }
 0x603   : > { %2420 = vmatpush3.bf16.xpose.msra.mxu1 %v2419_v62  ;;  %2444 = vmatpush3.bf16.xpose.msra.mxu0 %v2443_v33  ;;  %v334_v62 = vld [vmem:[%s327_s12] sm:$0x3] }
 0x604   : > { %2421 = vmatprep.subr.bf16.mxu1 %v2678_v0  ;;  %2445 = vmatprep.subr.bf16.mxu0 %v2678_v0  ;;  %v1243_v4 = vsel %vm1242_vm9, %v334_v62, 0.0 }
 0x60b   : > { %2423 = vmatpush3.bf16.xpose.msra.mxu1 %v2422_v6  ;;  %2447 = vmatpush3.bf16.xpose.msra.mxu0 %v2446_v36 }
 0x60c   : > { %2424 = vmatprep.subr.bf16.mxu1 %v2678_v0  ;;  %2448 = vmatprep.subr.bf16.mxu0 %v2678_v0 }
 0x613   : > { %2426 = vmatpush3.bf16.xpose.msra.mxu1 %v2425_v10  ;;  %2450 = vmatpush3.bf16.xpose.msra.mxu0 %v2449_v39 }
 0x614   : > { %2427 = vmatprep.subr.bf16.mxu1 %v2678_v0  ;;  %2451 = vmatprep.subr.bf16.mxu0 %v2678_v0 }
 0x61b   : > { %2429 = vmatpush3.bf16.xpose.msra.mxu1 %v2428_v18  ;;  %2453 = vmatpush3.bf16.xpose.msra.mxu0 %v2452_v42 }
 0x61c   : > { %2430 = vmatprep.subr.bf16.mxu1 %v2678_v0  ;;  %2454 = vmatprep.subr.bf16.mxu0 %v2678_v0 }
 0x623   : > { %2432 = vmatpush3.bf16.xpose.msra.mxu1 %v2431_v21 }
 0x624   : > { %2160 = vmatprep.subr.mxu1 %v2680_v1 }
 0x6bc   : > { %v2958_v46 = vpop.f32.mrb[6].mxu1  ;;  %v970_v47 = vpop.f32.mrb[8].mxu0 }
 0x6bd   : > { %v971_v48 = vadd.f32 %v970_v47, %v903_v45  ;;  %v2054_v49 = vpop.f32.mrb[7].mxu1  ;;  %v2089_v50 = vpop.f32.mrb[9].mxu0  ;;  %v2455_v45 = vpack.c.bf16 %v1094_v44, %v1093_v43  ;;  %v805_v47 = vsub.s32 4, %v2892_v63 }
 0x6bf   : > { %974 = vmax.xlane.f32.xlu1 %v971_v48  ;;  %2456 = vmatpush3.bf16.xpose.msra.mxu0 %v2455_v45  ;;  %v806_v49 = vrot.slane %v2900_v3, %v805_v47 }
 0x6c1   : > { %v874_v50 = vadd.f32 %v2958_v46, %v806_v49 }
 0x6c3   : > { %v881_v52 = vmul.f32 %v879_v51, %v874_v50  ;;  %vm877_vm7 = vcmp.ge.f32.partialorder %v874_v50, 0.0 }
 0x6c5   : > { %v882_v0 = vsel %vm877_vm7, %v874_v50, %v881_v52 }
 0x74c   : > { %v975_v11 = vpop.xlane.xlu1 %974 }
 0x74d   : > { %v976_v13 = vsub.f32 %v971_v48, %v975_v11 }
 0x74f   : > { %v977_v14 = vmul.f32 1.442695, %v976_v13 }
 0x751   : > { %2599 = vpow2.f32 %v977_v14 }
 0x75b   : > { %v2600_v15 = vpop.eup %2599 }
 0x75c   : > { %979 = vadd.xlane.f32.xlu1 %v2600_v15 }
 0x760   : > { %1244 = vadd.xlane.f32.xlu1 %v1243_v4 }
 0x7e9   : > { %v980_v48 = vpop.xlane.xlu1 %979 }
 0x7ea   : > { %2601 = vrcp.f32 %v980_v48 }
 0x7ed   : > { %v1245_v10 = vpop.xlane.xlu1 %1244 }
 0x7ee   : > { %v1246_v11 = vmax.f32 %v1245_v10, 1.0 }
 0x7f0   : > { %2603 = vrcp.f32 %v1246_v11 }
 0x7f4   : > { %v2602_v53 = vpop.eup %2601 }
 0x7f5   : > { %v982_v54 = vmul.f32 %v2602_v53, %v2600_v15 }
 0x7f7   : > { %v983_v55 = vmul.f32 %v982_v54, %v882_v0 }
 0x7f9   : > { %2123 = vmatmul.mubr.f32.vlgmr.msra.gmra.mrb[8].mxu1 %v983_v55 }
 0x7fa   : > { %2162 = vmatprep.mubr.msk.f32.mxu1 %vm2679_vm0, %v2680_v1  ;;  %v1097_v1 = vsub.s32 7, %v2892_v63  ;;  %v2604_v13 = vpop.eup %2603 }
 0x7fc   : > { %v1098_v5 = vrot.slane %v2900_v3, %v1097_v1 }
 0x8cc   : > { %v1071_v58 = vpop.f32.mrb[8].mxu1 }
 0x8cd   : > { %v1072_v59 = vadd.f32 %v1071_v58, %v1004_v57  ;;  %v2124_v60 = vpop.f32.mrb[9].mxu1 }
 0x8cf   : > { %vm1075_vm8 = vcmp.ge.f32.partialorder %v1072_v59, 0.0  ;;  %v1076_v46 = vmul.f32 0.01, %v1072_v59 }
 0x8d1   : > { %v1077_v61 = vsel %vm1075_vm8, %v1072_v59, %v1076_v46 }
 0x8d2   : > { %2158 = vmatmul.mubr.f32.vlgmr.msra.gmra.mrb[10].mxu0 %v1077_v61 }
 0x9a5   : > { %v1165_v6 = vpop.f32.mrb[10].mxu0 }
 0x9a6   : > { %v1166_v7 = vadd.f32 %v1165_v6, %v1098_v5  ;;  %v2159_v9 = vpop.f32.mrb[11].mxu0 }
 0x9a8   : > { %2161 = vmatpush3.msra.mxu1 %v1166_v7 }
 0x9a9   : > { %2163 = vmatmul.mubr.msk.f32.vlgmr.msra.gmra.mrb[10].mxu1 %vm338_vm1, %v334_v62 }
 0xa77   : > { %1252 = sbr.rel (%p3086_p3) target bundleno = 2688 (0xa80), region = 56 }
 0xa7c   : > { %v1238_v14 = vpop.f32.mrb[10].mxu1 }
 0xa7d   : > { %v2989_v15 = vmul.f32 %v2604_v13, %v1238_v14  ;;  %v2164_v16 = vpop.f32.mrb[11].mxu1 }
 0xa7f   : > { %1253 = vst [vmem:[#allocation2] sm:$0x3] %v2989_v15 }
 0xa80 PF: > { %p1750_p4 = scmp.ne.s32.totalorder %s2733_s25, 1 }
 0xa81   : > { %v1277_v3 = vld [vmem:[#allocation3 + $0x300] sm:$0xff] (!%p1750_p4)  ;;  %v1278_v17 = vld [vmem:[#allocation3 + $0x308] sm:$0xff] (!%p1750_p4)  ;;  %v2683_v19 = vmov (!%p1750_p4), 0.0|0.0   ;;  %vm2684_vm10 = vmmov (!%p1750_p4), 0   ;;  %v2685_v23 = vmov (!%p1750_p4), 0.0   ;;  %v1279_v24 = vld [vmem:[#allocation3 + $0x310] sm:$0xff] (!%p1750_p4) }
 0xa82   : > { %1257 = sbr.rel (%p1750_p4) target bundleno = 3409 (0xd51), region = 60  ;;  %v1260_v18 = vld [vmem:[#allocation3 + $0x280] sm:$0xff] (!%p1750_p4)  ;;  %2457 = vmatprep.subr.bf16.mxu0 (!%p1750_p4), %v2683_v19  ;;  %2481 = vmatprep.subr.bf16.mxu1 (!%p1750_p4), %v2683_v19  ;;  %v2458_v20 = vpack.c.bf16 (!%p1750_p4), %v1278_v17, %v1277_v3  ;;  %v1261_v21 = vld [vmem:[#allocation3 + $0x288] sm:$0xff] (!%p1750_p4)  ;;  %v1280_v25 = vld [vmem:[#allocation3 + $0x318] sm:$0xff] (!%p1750_p4) }
 0xa83   : > { %v2482_v22 = vpack.c.bf16 (!%p1750_p4), %v1261_v21, %v1260_v18  ;;  %2197 = vmatprep.mubr.msk.f32.mxu0 (!%p1750_p4), %vm2684_vm10, %v2685_v23  ;;  %2232 = vmatprep.mubr.msk.f32.mxu1 (!%p1750_p4), %vm2684_vm10, %v2685_v23  ;;  %v1262_v26 = vld [vmem:[#allocation3 + $0x290] sm:$0xff] (!%p1750_p4)  ;;  %v1263_v27 = vld [vmem:[#allocation3 + $0x298] sm:$0xff] (!%p1750_p4)  ;;  %v2461_v28 = vpack.c.bf16 (!%p1750_p4), %v1280_v25, %v1279_v24  ;;  %v1281_v30 = vld [vmem:[#allocation3 + $0x320] sm:$0xff] (!%p1750_p4) }
 0xa84   : > { %2459 = vmatpush3.bf16.xpose.msra.mxu0 (!%p1750_p4), %v2458_v20  ;;  %v2485_v29 = vpack.c.bf16 (!%p1750_p4), %v1263_v27, %v1262_v26  ;;  %v1282_v31 = vld [vmem:[#allocation3 + $0x328] sm:$0xff] (!%p1750_p4)  ;;  %v1264_v32 = vld [vmem:[#allocation3 + $0x2a0] sm:$0xff] (!%p1750_p4)  ;;  %v1283_v36 = vld [vmem:[#allocation3 + $0x330] sm:$0xff] (!%p1750_p4) }
 0xa85   : > { %2483 = vmatpush3.bf16.xpose.msra.mxu1 (!%p1750_p4), %v2482_v22  ;;  %2460 = vmatprep.subr.bf16.mxu0 (!%p1750_p4), %v2683_v19  ;;  %v1265_v33 = vld [vmem:[#allocation3 + $0x2a8] sm:$0xff] (!%p1750_p4)  ;;  %v2464_v34 = vpack.c.bf16 (!%p1750_p4), %v1282_v31, %v1281_v30  ;;  %v1284_v37 = vld [vmem:[#allocation3 + $0x338] sm:$0xff] (!%p1750_p4)  ;;  %v1266_v38 = vld [vmem:[#allocation3 + $0x2b0] sm:$0xff] (!%p1750_p4) }
 0xa86   : > { %2484 = vmatprep.subr.bf16.mxu1 (!%p1750_p4), %v2683_v19  ;;  %v2488_v35 = vpack.c.bf16 (!%p1750_p4), %v1265_v33, %v1264_v32  ;;  %v1267_v39 = vld [vmem:[#allocation3 + $0x2b8] sm:$0xff] (!%p1750_p4)  ;;  %v2467_v40 = vpack.c.bf16 (!%p1750_p4), %v1284_v37, %v1283_v36  ;;  %v1285_v42 = vld [vmem:[#allocation3 + $0x340] sm:$0xff] (!%p1750_p4)  ;;  %v1286_v43 = vld [vmem:[#allocation3 + $0x348] sm:$0xff] (!%p1750_p4) }
 0xa87   : > { %v2491_v41 = vpack.c.bf16 (!%p1750_p4), %v1267_v39, %v1266_v38  ;;  %v1268_v44 = vld [vmem:[#allocation3 + $0x2c0] sm:$0xff] (!%p1750_p4)  ;;  %v1269_v45 = vld [vmem:[#allocation3 + $0x2c8] sm:$0xff] (!%p1750_p4)  ;;  %v2470_v47 = vpack.c.bf16 (!%p1750_p4), %v1286_v43, %v1285_v42  ;;  %v1287_v49 = vld [vmem:[#allocation3 + $0x350] sm:$0xff] (!%p1750_p4) }
 0xa88   : > { %v2494_v48 = vpack.c.bf16 (!%p1750_p4), %v1269_v45, %v1268_v44  ;;  %v1288_v50 = vld [vmem:[#allocation3 + $0x358] sm:$0xff] (!%p1750_p4)  ;;  %v1270_v51 = vld [vmem:[#allocation3 + $0x2d0] sm:$0xff] (!%p1750_p4)  ;;  %v1289_v0 = vld [vmem:[#allocation3 + $0x360] sm:$0xff] (!%p1750_p4) }
 0xa89   : > { %v1271_v52 = vld [vmem:[#allocation3 + $0x2d8] sm:$0xff]  ;;  %v2473_v53 = vpack.c.bf16 %v1288_v50, %v1287_v49  ;;  %v1290_v55 = vld [vmem:[#allocation3 + $0x368] sm:$0xff]  ;;  %v1272_v56 = vld [vmem:[#allocation3 + $0x2e0] sm:$0xff] }
 0xa8a   : > { %v2497_v54 = vpack.c.bf16 %v1271_v52, %v1270_v51  ;;  %v1273_v57 = vld [vmem:[#allocation3 + $0x2e8] sm:$0xff]  ;;  %v2476_v58 = vpack.c.bf16 %v1290_v55, %v1289_v0  ;;  %v1291_v60 = vld [vmem:[#allocation3 + $0x370] sm:$0xff]  ;;  %v1292_v46 = vld [vmem:[#allocation3 + $0x378] sm:$0xff]  ;;  %v1436_v0 = vrot.slane %v2909_v12, %v2895_v2 }
 0xa8b   : > { %v2500_v59 = vpack.c.bf16 %v1273_v57, %v1272_v56  ;;  %v1274_v61 = vld [vmem:[#allocation3 + $0x2f0] sm:$0xff]  ;;  %v1275_v62 = vld [vmem:[#allocation3 + $0x2f8] sm:$0xff]  ;;  %v2479_v4 = vpack.c.bf16 %v1292_v46, %v1291_v60  ;;  %v1441_v5 = vld [vmem:[#allocation3 + $0x380] sm:$0xff] }
 0xa8c   : > { %2462 = vmatpush3.bf16.xpose.msra.mxu0 %v2461_v28  ;;  %v2503_v1 = vpack.c.bf16 %v1275_v62, %v1274_v61  ;;  %v1442_v6 = vld [vmem:[#allocation3 + $0x388] sm:$0xff]  ;;  %v1258_v9 = vld [vmem:[#allocation2] sm:$0x3]  ;;  %v1443_v10 = vld [vmem:[#allocation3 + $0x390] sm:$0xff] }
 0xa8d   : > { %2486 = vmatpush3.bf16.xpose.msra.mxu1 %v2485_v29  ;;  %2463 = vmatprep.subr.bf16.mxu0 %v2683_v19  ;;  %v2506_v7 = vpack.c.bf16 %v1442_v6, %v1441_v5  ;;  %v1444_v11 = vld [vmem:[#allocation3 + $0x398] sm:$0xff]  ;;  %v1445_v14 = vld [vmem:[#allocation3 + $0x3a0] sm:$0xff]  ;;  %v1446_v16 = vld [vmem:[#allocation3 + $0x3a8] sm:$0xff] }
 0xa8e   : > { %2487 = vmatprep.subr.bf16.mxu1 %v2683_v19  ;;  %v2509_v13 = vpack.c.bf16 %v1444_v11, %v1443_v10  ;;  %v2512_v3 = vpack.c.bf16 %v1446_v16, %v1445_v14  ;;  %v1448_v17 = vld [vmem:[#allocation3 + $0x3b8] sm:$0xff]  ;;  %v1449_v20 = vld [vmem:[#allocation3 + $0x3c0] sm:$0xff]  ;;  %v1450_v21 = vld [vmem:[#allocation3 + $0x3c8] sm:$0xff] }
 0xa8f   : > { %v2518_v22 = vpack.c.bf16 %v1450_v21, %v1449_v20  ;;  %v1452_v24 = vld [vmem:[#allocation3 + $0x3d8] sm:$0xff]  ;;  %v1453_v26 = vld [vmem:[#allocation3 + $0x3e0] sm:$0xff]  ;;  %v1454_v27 = vld [vmem:[#allocation3 + $0x3e8] sm:$0xff] }
 0xa90   : > { %v2524_v28 = vpack.c.bf16 %v1454_v27, %v1453_v26  ;;  %v1455_v29 = vld [vmem:[#allocation3 + $0x3f0] sm:$0xff]  ;;  %v1456_v30 = vld [vmem:[#allocation3 + $0x3f8] sm:$0xff]  ;;  %v1534_v32 = vld [vmem:[#allocation3 + $0x400] sm:$0xff] }
 0xa91   : > { %v2527_v31 = vpack.c.bf16 %v1456_v30, %v1455_v29  ;;  %v1535_v33 = vld [vmem:[#allocation3 + $0x408] sm:$0xff]  ;;  %v1537_v36 = vld [vmem:[#allocation3 + $0x418] sm:$0xff]  ;;  %v1538_v38 = vld [vmem:[#allocation3 + $0x420] sm:$0xff] }
 0xa92   : > { %v1539_v39 = vld [vmem:[#allocation3 + $0x428] sm:$0xff]  ;;  %v1541_v42 = vld [vmem:[#allocation3 + $0x438] sm:$0xff]  ;;  %v1542_v44 = vld [vmem:[#allocation3 + $0x440] sm:$0xff] }
 0xa93   : > { %v1543_v45 = vld [vmem:[#allocation3 + $0x448] sm:$0xff]  ;;  %v1545_v49 = vld [vmem:[#allocation3 + $0x458] sm:$0xff]  ;;  %v1546_v51 = vld [vmem:[#allocation3 + $0x460] sm:$0xff] }
 0xa94   : > { %2465 = vmatpush3.bf16.xpose.msra.mxu0 %v2464_v34  ;;  %v2530_v34 = vpack.c.bf16 %v1535_v33, %v1534_v32  ;;  %v1547_v52 = vld [vmem:[#allocation3 + $0x468] sm:$0xff]  ;;  %v1548_v61 = vld [vmem:[#allocation3 + $0x470] sm:$0xff]  ;;  %v1549_v62 = vld [vmem:[#allocation3 + $0x478] sm:$0xff] }
 0xa95   : > { %2489 = vmatpush3.bf16.xpose.msra.mxu1 %v2488_v35  ;;  %2466 = vmatprep.subr.bf16.mxu0 %v2683_v19  ;;  %v1536_v35 = vld [vmem:[#allocation3 + $0x410] sm:$0xff] }
 0xa96   : > { %2490 = vmatprep.subr.bf16.mxu1 %v2683_v19  ;;  %v2533_v37 = vpack.c.bf16 %v1537_v36, %v1536_v35 }
 0xa9c   : > { %2468 = vmatpush3.bf16.xpose.msra.mxu0 %v2467_v40  ;;  %v2536_v40 = vpack.c.bf16 %v1539_v39, %v1538_v38 }
 0xa9d   : > { %2492 = vmatpush3.bf16.xpose.msra.mxu1 %v2491_v41  ;;  %2469 = vmatprep.subr.bf16.mxu0 %v2683_v19  ;;  %v1540_v41 = vld [vmem:[#allocation3 + $0x430] sm:$0xff] }
 0xa9e   : > { %2493 = vmatprep.subr.bf16.mxu1 %v2683_v19  ;;  %v2539_v43 = vpack.c.bf16 %v1541_v42, %v1540_v41 }
 0xaa4   : > { %2471 = vmatpush3.bf16.xpose.msra.mxu0 %v2470_v47  ;;  %v2542_v47 = vpack.c.bf16 %v1543_v45, %v1542_v44 }
 0xaa5   : > { %2495 = vmatpush3.bf16.xpose.msra.mxu1 %v2494_v48  ;;  %2472 = vmatprep.subr.bf16.mxu0 %v2683_v19  ;;  %v1544_v48 = vld [vmem:[#allocation3 + $0x450] sm:$0xff] }
 0xaa6   : > { %2496 = vmatprep.subr.bf16.mxu1 %v2683_v19  ;;  %v2545_v50 = vpack.c.bf16 %v1545_v49, %v1544_v48 }
 0xaac   : > { %2474 = vmatpush3.bf16.xpose.msra.mxu0 %v2473_v53  ;;  %v2548_v53 = vpack.c.bf16 %v1547_v52, %v1546_v51 }
 0xaad   : > { %2498 = vmatpush3.bf16.xpose.msra.mxu1 %v2497_v54  ;;  %2475 = vmatprep.subr.bf16.mxu0 %v2683_v19 }
 0xaae   : > { %2499 = vmatprep.subr.bf16.mxu1 %v2683_v19 }
 0xab4   : > { %2477 = vmatpush3.bf16.xpose.msra.mxu0 %v2476_v58 }
 0xab5   : > { %2501 = vmatpush3.bf16.xpose.msra.mxu1 %v2500_v59  ;;  %2478 = vmatprep.subr.bf16.mxu0 %v2683_v19 }
 0xab6   : > { %2502 = vmatprep.subr.bf16.mxu1 %v2683_v19 }
 0xabc   : > { %2480 = vmatpush3.bf16.xpose.msra.mxu0 %v2479_v4  ;;  %v2551_v4 = vpack.c.bf16 %v1549_v62, %v1548_v61 }
 0xabd   : > { %2504 = vmatpush3.bf16.xpose.msra.mxu1 %v2503_v1  ;;  %2505 = vmatprep.subr.bf16.mxu0 %v2683_v19 }
 0xabe   : > { %2529 = vmatprep.subr.bf16.mxu1 %v2683_v19 }
 0xac3   : > { %2198 = vmatmul.mubr.f32.vlgmr.msra.gmra.mrb[0].mxu0 %v2989_v15  ;;  %v1447_v15 = vld [vmem:[#allocation3 + $0x3b0] sm:$0xff] }
 0xac4   : > { %2233 = vmatmul.mubr.f32.vlgmr.msra.gmra.mrb[0].mxu1 %v1258_v9  ;;  %2507 = vmatpush3.bf16.xpose.msra.mxu0 %v2506_v7  ;;  %v2515_v18 = vpack.c.bf16 %v1448_v17, %v1447_v15  ;;  %v1552_v9 = vsub.s32 2, %v2892_v63 }
 0xac5   : > { %2508 = vmatprep.subr.bf16.mxu0 %v2683_v19  ;;  %2267 = vmatprep.mubr.msk.f32.mxu0 %vm2684_vm10, %v2685_v23 }
 0xac6   : > { %2302 = vmatprep.mubr.msk.f32.mxu1 %vm2684_vm10, %v2685_v23  ;;  %v1451_v23 = vld [vmem:[#allocation3 + $0x3d0] sm:$0xff]  ;;  %2531 = vmatpush3.bf16.xpose.msra.mxu1 %v2530_v34  ;;  %v1553_v10 = vrot.slane %v2909_v12, %v1552_v9 }
 0xac7   : > { %v2521_v25 = vpack.c.bf16 %v1452_v24, %v1451_v23  ;;  %2532 = vmatprep.subr.bf16.mxu1 %v2683_v19 }
 0xacc   : > { %2510 = vmatpush3.bf16.xpose.msra.mxu0 %v2509_v13 }
 0xacd   : > { %2511 = vmatprep.subr.bf16.mxu0 %v2683_v19 }
 0xace   : > { %2534 = vmatpush3.bf16.xpose.msra.mxu1 %v2533_v37 }
 0xacf   : > { %2535 = vmatprep.subr.bf16.mxu1 %v2683_v19 }
 0xad4   : > { %2513 = vmatpush3.bf16.xpose.msra.mxu0 %v2512_v3 }
 0xad5   : > { %2514 = vmatprep.subr.bf16.mxu0 %v2683_v19 }
 0xad6   : > { %2537 = vmatpush3.bf16.xpose.msra.mxu1 %v2536_v40 }
 0xad7   : > { %2538 = vmatprep.subr.bf16.mxu1 %v2683_v19 }
 0xadc   : > { %2516 = vmatpush3.bf16.xpose.msra.mxu0 %v2515_v18 }
 0xadd   : > { %2517 = vmatprep.subr.bf16.mxu0 %v2683_v19 }
 0xade   : > { %2540 = vmatpush3.bf16.xpose.msra.mxu1 %v2539_v43 }
 0xadf   : > { %2541 = vmatprep.subr.bf16.mxu1 %v2683_v19 }
 0xae4   : > { %2519 = vmatpush3.bf16.xpose.msra.mxu0 %v2518_v22 }
 0xae5   : > { %2520 = vmatprep.subr.bf16.mxu0 %v2683_v19 }
 0xae6   : > { %2543 = vmatpush3.bf16.xpose.msra.mxu1 %v2542_v47 }
 0xae7   : > { %2544 = vmatprep.subr.bf16.mxu1 %v2683_v19 }
 0xaec   : > { %2522 = vmatpush3.bf16.xpose.msra.mxu0 %v2521_v25 }
 0xaed   : > { %2523 = vmatprep.subr.bf16.mxu0 %v2683_v19 }
 0xaee   : > { %2546 = vmatpush3.bf16.xpose.msra.mxu1 %v2545_v50 }
 0xaef   : > { %2547 = vmatprep.subr.bf16.mxu1 %v2683_v19 }
 0xaf4   : > { %2525 = vmatpush3.bf16.xpose.msra.mxu0 %v2524_v28 }
 0xaf5   : > { %2526 = vmatprep.subr.bf16.mxu0 %v2683_v19 }
 0xaf6   : > { %2549 = vmatpush3.bf16.xpose.msra.mxu1 %v2548_v53 }
 0xaf7   : > { %2550 = vmatprep.subr.bf16.mxu1 %v2683_v19  ;;  %v1460_v19 = vrot.slane %v2909_v12, %v738_v8 }
 0xafc   : > { %2528 = vmatpush3.bf16.xpose.msra.mxu0 %v2527_v31 }
 0xafe   : > { %2552 = vmatpush3.bf16.xpose.msra.mxu1 %v2551_v4 }
 0xb96   : > { %v1359_v54 = vpop.f32.mrb[0].mxu0 }
 0xb97   : > { %v1429_v55 = vpop.f32.mrb[0].mxu1  ;;  %v2199_v56 = vpop.f32.mrb[1].mxu0 }
 0xb98   : > { %v1430_v57 = vadd.f32 %v1429_v55, %v1359_v54  ;;  %v2234_v58 = vpop.f32.mrb[1].mxu1 }
 0xb9a   : > { %v1437_v59 = vadd.f32 %v1436_v0, %v1430_v57 }
 0xb9c   : > { %v1438_v60 = vmul.f32 0.999995, %v1437_v59 }
 0xb9e   : > { %v1439_v46 = vmax.f32 %v1438_v60, 0.0 }
 0xba0   : > { %2268 = vmatmul.mubr.f32.vlgmr.msra.gmra.mrb[2].mxu0 %v1439_v46 }
 0xc73   : > { %v1527_v1 = vpop.f32.mrb[2].mxu0 }
 0xc74   : > { %v1528_v5 = vadd.f32 %v1527_v1, %v1460_v19  ;;  %v2269_v6 = vpop.f32.mrb[3].mxu0 }
 0xc76   : > { %v1531_v2 = vmul.f32 0.999995, %v1528_v5 }
 0xc78   : > { %v1532_v7 = vmax.f32 %v1531_v2, 0.0 }
 0xc7a   : > { %2303 = vmatmul.mubr.f32.vlgmr.msra.gmra.mrb[2].mxu1 %v1532_v7 }
 0xd4d   : > { %v1620_v11 = vpop.f32.mrb[2].mxu1 }
 0xd4e   : > { %v1621_v13 = vadd.f32 %v1620_v11, %v1553_v10  ;;  %v2304_v14 = vpop.f32.mrb[3].mxu1 }
 0xd50   : > { %1624 = vst [vmem:[#allocation6] sm:$0x3] %v1621_v13 }
 0xd51 PF: > { %p2571_p6 = scmp.eq.s32.totalorder %s2733_s25, 1  ;;  %s2686_s19 = smov [#allocation6]  }
 0xd52   : > { %s1632_s13 = sshll.u32 %s2686_s19, 4  ;;  %s1633_s13 = int_to_ptr.vmem [resolvable:$true] %s1632_s13 }
 0xd53   : > { %s2633_s14 = scalar_lea.vmem %s1633_s13, 32  ;;  %p2640_p13 = scmp.lt.s32.totalorder %s1633_s13, %s1633_s13 }
 0xd54   : > { %p2634_p10 = scmp.ne.s32.totalorder %s1633_s13, %s2633_s14  ;;  %p2641_p0 = scmp.lt.s32.totalorder %s2633_s14, %s2633_s14 }
 0xd56   : > { %p2635_p11 = pnand %p2634_p10, %p2571_p6  ;;  %p2642_p1 = por %p2641_p0, %p2640_p13 }
 0xd58   : > { %p2636_p12 = pneg %p2635_p11 }
 0xd5a   : > { %p2643_p5 = pnand %p2642_p1, %p2636_p12 }
 0xd5c   : > { %2646 = shalt.err (!%p2643_p5)
}
 0xd5d   : > { %s2647_s17 = scalar_lea.hbm %s3076_s7, 32 }
 0xd5e   : > { %p2648_p7 = scmp.ne.s32.totalorder %s3076_s7, %s2647_s17  ;;  %p2653_p2 = scmp.lt.u32.totalorder %s2647_s17, %s3076_s7 }
 0xd60   : > { %p2649_p9 = pnand %p2648_p7, %p2571_p6 }
 0xd62   : > { %p2650_p8 = pneg %p2649_p9 }
 0xd64   : > { %p2655_p3 = pnand %p2653_p2, %p2650_p8 }
 0xd66   : > { %2658 = shalt.err (!%p2655_p3)
}
 0xd67   : > { %2562 = dma.vmem_to_hbm [thread:$0]  (%p2571_p6), %s1633_s13, 32, %s3076_s7, [#allocation5]  }
 0xd68   : > { %2668 = dma.done.wait (%p2571_p6), [#allocation5], 32  }
 0xd69   : > { %2670 = vsyncadd (%p2571_p6), [#allocation5], 4294967264 }
 0xd6a PF: > { %s19_s24 = sadd.s32 1, %s2673_s24  }
 0xd6b   : > { %p16_p4 = scmp.ge.s32.totalorder %s19_s24, 4  }
 0xd6d   :  { %18 = sbr.rel (!%p16_p4) target bundleno = 2 (0x2), region = 105 }
 0xd74   :  { %1645 = vsyncpa [#allocation4], 1 }
 0xd75   :  { %1647 = vsyncpa [#allocation4 + $0x1], 1 }
 0xd76   :  { %1648 = vsyncpa [#allocation5], 1 }
 0xd77   :  { %1650 = vsyncpa [#allocation5 + $0x1], 1 }

</bundles_post_ra>
